<compile_context>
chip_gen: v6e
topology: v6e:2x2x1
jax: 0.10.0
libtpu: 0.0.40
codegen_flags: <defaults>
</compile_context>

<pallas_src>
import jax
import jax.numpy as jnp
from jax import lax
from jax.experimental import pallas as pl
from jax.experimental.pallas import tpu as pltpu

# ---- configuration (hp_dict defaults of the PyTorch LSTMModel) --------------
BATCH       = 2
TIME_STEPS  = 8
INPUT_DIM   = 16
UNITS_1     = 32            # hp_dict['units_1']
FC_UNITS    = 32            # hp_dict['fc_units']
NUM_CLASSES = 5
LSTM_OUT    = 2 * UNITS_1   # bidirectional -> attention_input_dim = 64
EPS         = 1e-5


# -----------------------------------------------------------------------------
# Single fused kernel.  Input rows are time-major flattened: row = t*B + b.
# -----------------------------------------------------------------------------
def _fused_kernel(x2_ref,      # (T*B, D)
                  wih_ref,     # (D, 8H)   interleaved gate cols, i/f/o prescaled by 0.5
                  whh_ref,     # (2H, 8H)  block-diag fwd/bwd recurrent weight (prescaled)
                  gvec_ref,    # (4, 8H)   rows: [bias | gate_a | gate_b | fwd_lane_mask]
                  wqkv_ref,    # (2H, 3F)  bn1 + 1/sqrt(F) folded in
                  hbias_ref,   # (3, 3F)   rows: [bqkv | bfc (padded) | bcl (padded)]
                  mask_ref,    # (TB, TB)  additive attention mask (0 / -1e30)
                  sel_ref,     # (B, TB)   mean-over-time pooling matrix (1/T entries)
                  wfc_ref,     # (2H, FC)
                  wcl_ref,     # (FC, C)   bn_fc folded in
                  out_ref):    # (B, C)    logits
    TB = x2_ref.shape[0]
    B = out_ref.shape[0]
    T = TB // B
    H = whh_ref.shape[0] // 2
    F = 2 * H
    FC = wfc_ref.shape[1]
    C = out_ref.shape[1]

    gvec = gvec_ref[...]
    bias_all = gvec[0:1, :]            # folded (bias_ih + bias_hh), prescaled
    gate_a   = gvec[1:2, :]            # 0.5 on i/f/o lanes, 1.0 on g lanes
    gate_b   = gvec[2:3, :]            # 0.5 on i/f/o lanes, 0.0 on g lanes
    fwd_lane = gvec[3:4, :] > 0.5      # forward-direction column indicator

    whh = whh_ref[...]

    # ---- bidirectional LSTM --------------------------------------------------
    # Hoisted input projection: one matmul covers both directions & all steps.
    gates_x = (jnp.dot(x2_ref[...], wih_ref[...],
                       preferred_element_type=jnp.float32) + bias_all)   # (TB, 8H)

    h = jnp.zeros((B, F), jnp.float32)   # [h_f | h_b]
    c = jnp.zeros((B, F), jnp.float32)   # [c_f | c_b]
    hs = []                              # per-step fused hidden states (stay in vregs)

    for s in range(T):
        sb = T - 1 - s
        # forward lanes take time s, backward lanes take time T-1-s
        gx = jnp.where(fwd_lane,
                       gates_x[s * B:(s + 1) * B, :],
                       gates_x[sb * B:(sb + 1) * B, :])
        z = jnp.dot(h, whh, preferred_element_type=jnp.float32) + gx      # (B, 8H)
        t_all = jnp.tanh(z)                       # single full-width EUP pass
        g_all = t_all * gate_a + gate_b           # sigmoid on i/f/o lanes, tanh on g
        i_g = g_all[:, 0 * F:1 * F]
        f_g = g_all[:, 1 * F:2 * F]
        o_g = g_all[:, 2 * F:3 * F]
        g_g = g_all[:, 3 * F:4 * F]
        c = f_g * c + i_g * g_g
        h = o_g * jnp.tanh(c)
        hs.append(h)

    # Assemble the (TB, 2H) sequence output: row = t*B + b, fwd cols 0:H come
    # from step t, bwd cols H:2H from step T-1-t.  Values never leave vregs.
    seq = jnp.concatenate(
        [jnp.concatenate([hs[t][:, 0:H], hs[T - 1 - t][:, H:2 * H]], axis=1)
         for t in range(T)], axis=0)                                      # (TB, 2H)

    # ---- self-attention (BatchNorm1d folded into wqkv / bqkv) ------------------
    hbias = hbias_ref[...]
    qkv = (jnp.dot(seq, wqkv_ref[...], preferred_element_type=jnp.float32)
           + hbias[0:1, :])                                               # (TB, 3F)
    q = qkv[:, 0 * F:1 * F]       # 1/sqrt(F) already baked into W_q / b_q
    k = qkv[:, 1 * F:2 * F]
    v = qkv[:, 2 * F:3 * F]

    scores = lax.dot_general(q, k, (((1,), (1,)), ((), ())),
                             preferred_element_type=jnp.float32) + mask_ref[...]
    m = jnp.max(scores, axis=-1, keepdims=True)
    p = jnp.exp(scores - m)
    attn = p / jnp.sum(p, axis=-1, keepdims=True)                         # exact divide

    pooled = jnp.dot(sel_ref[...], attn, preferred_element_type=jnp.float32)  # (B, TB)
    ctx = jnp.dot(pooled, v, preferred_element_type=jnp.float32)              # (B, F)

    # ---- FC head: Linear -> ReLU -> (bn_fc folded) -> classifier ---------------
    fc = jnp.maximum(
        jnp.dot(ctx, wfc_ref[...], preferred_element_type=jnp.float32)
        + hbias[1:2, 0:FC], 0.0)
    out_ref[...] = (jnp.dot(fc, wcl_ref[...], preferred_element_type=jnp.float32)
                    + hbias[2:3, 0:C])


# -----------------------------------------------------------------------------
# Wrapper
# -----------------------------------------------------------------------------
def _vmem_spec():
    return pl.BlockSpec(memory_space=pltpu.MemorySpace.VMEM)


@jax.jit
def lstm_model_forward(x, kp):
    """x: (B, T, D) float32, batch-first like the PyTorch module."""
    B, T, D = x.shape
    # time-major flattened rows (row = t*B + b)
    x2 = jnp.transpose(x, (1, 0, 2)).reshape(T * B, D)
    return pl.pallas_call(
        _fused_kernel,
        out_shape=jax.ShapeDtypeStruct((B, NUM_CLASSES), jnp.float32),
        in_specs=[_vmem_spec() for _ in range(10)],
        out_specs=_vmem_spec(),
    )(x2, kp['wih'], kp['whh'], kp['gvec'], kp['wqkv'], kp['hbias'],
      kp['mask'], kp['sel'], kp['wfc'], kp['wcl'])


# -----------------------------------------------------------------------------
# Parameters: PyTorch-layout init + one-time repack into kernel layout
# -----------------------------------------------------------------------------
def init_params(key):
    """Random parameters in PyTorch layout (LSTM gate row order i,f,g,o)."""
    H, D, F, FC, C = UNITS_1, INPUT_DIM, LSTM_OUT, FC_UNITS, NUM_CLASSES
    keys = iter(jax.random.split(key, 32))

    def u(shape, bound):
        return jax.random.uniform(next(keys), shape, jnp.float32, -bound, bound)

    k_lstm = 1.0 / (H ** 0.5)
    p = {}
    for suf in ('f', 'b'):
        p['weight_ih_' + suf] = u((4 * H, D), k_lstm)
        p['weight_hh_' + suf] = u((4 * H, H), k_lstm)
        p['bias_ih_' + suf] = u((4 * H,), k_lstm)
        p['bias_hh_' + suf] = u((4 * H,), k_lstm)

    p['bn1_gamma'] = jnp.ones((F,), jnp.float32)
    p['bn1_beta'] = jnp.zeros((F,), jnp.float32)
    p['bn1_mean'] = jnp.zeros((F,), jnp.float32)
    p['bn1_var'] = jnp.ones((F,), jnp.float32)

    k_att = 1.0 / (F ** 0.5)
    for name in ('q', 'k', 'v'):
        p['w' + name] = u((F, F), k_att)
        p['b' + name] = u((F,), k_att)

    p['fc_w'] = u((FC, F), k_att)
    p['fc_b'] = u((FC,), k_att)

    p['bnfc_gamma'] = jnp.ones((FC,), jnp.float32)
    p['bnfc_beta'] = jnp.zeros((FC,), jnp.float32)
    p['bnfc_mean'] = jnp.zeros((FC,), jnp.float32)
    p['bnfc_var'] = jnp.ones((FC,), jnp.float32)

    k_cl = 1.0 / (FC ** 0.5)
    p['cl_w'] = u((C, FC), k_cl)
    p['cl_b'] = u((C,), k_cl)
    return p


def prepare_kernel_params(p):
    """One-time repack of PyTorch-layout params into the fused-kernel layout."""
    H, F, FC, C = UNITS_1, LSTM_OUT, FC_UNITS, NUM_CLASSES
    T, B = TIME_STEPS, BATCH
    TB = T * B
    G8 = 8 * H

    # gate permutation: PyTorch rows [i, f, g, o] -> kernel gate order [i, f, o, g]
    perm = jnp.concatenate([jnp.arange(0, 2 * H),        # i, f
                            jnp.arange(3 * H, 4 * H),    # o
                            jnp.arange(2 * H, 3 * H)])   # g

    def lstm_dir(suf):
        wih = p['weight_ih_' + suf][perm].T                       # (D, 4H)
        whh = p['weight_hh_' + suf][perm].T                       # (H, 4H)
        bias = (p['bias_ih_' + suf] + p['bias_hh_' + suf])[perm]  # (4H,)
        return wih, whh, bias

    wih_f, whh_f, b_f = lstm_dir('f')
    wih_b, whh_b, b_b = lstm_dir('b')

    def interleave_cols(a_f, a_b):
        # (..., 4H) per direction -> (..., 8H), fused col = gate*2H + dir*H + unit
        sf = a_f.reshape(a_f.shape[:-1] + (4, H))
        sb = a_b.reshape(a_b.shape[:-1] + (4, H))
        return jnp.stack([sf, sb], axis=-2).reshape(a_f.shape[:-1] + (G8,))

    wih = interleave_cols(wih_f, wih_b)                           # (D, 8H)
    bias_all = interleave_cols(b_f, b_b)                          # (8H,)
    zeros_h = jnp.zeros((H, 4 * H), jnp.float32)
    whh = jnp.concatenate([interleave_cols(whh_f, zeros_h),       # rows 0:H  = h_f
                           interleave_cols(zeros_h, whh_b)],      # rows H:2H = h_b
                          axis=0)                                 # (2H, 8H)

    # Fold sigmoid(x) = 0.5*tanh(0.5*x)+0.5 prescale into i/f/o columns.
    col_gate = jnp.arange(G8) // (2 * H)                          # 0=i,1=f,2=o,3=g
    is_sig = col_gate < 3
    prescale = jnp.where(is_sig, 0.5, 1.0).astype(jnp.float32)
    wih = wih * prescale
    whh = whh * prescale
    bias_all = bias_all * prescale

    gate_a = jnp.where(is_sig, 0.5, 1.0).astype(jnp.float32)
    gate_b = jnp.where(is_sig, 0.5, 0.0).astype(jnp.float32)
    fwd_lane = (((jnp.arange(G8) // H) % 2) == 0).astype(jnp.float32)
    gvec = jnp.stack([bias_all, gate_a, gate_b, fwd_lane], axis=0)  # (4, 8H)

    # BatchNorm1d (eval) folded into Q/K/V projection; 1/sqrt(F) baked into Q.
    bn1_s = p['bn1_gamma'] / jnp.sqrt(p['bn1_var'] + EPS)
    bn1_t = p['bn1_beta'] - p['bn1_mean'] * bn1_s
    att_scale = 1.0 / (F ** 0.5)
    wqkv_cat = jnp.concatenate([p['wq'].T * att_scale, p['wk'].T, p['wv'].T],
                               axis=1)                            # (F, 3F)
    bqkv_cat = jnp.concatenate([p['bq'] * att_scale, p['bk'], p['bv']])   # (3F,)
    wqkv = bn1_s[:, None] * wqkv_cat
    bqkv = bqkv_cat + bn1_t @ wqkv_cat

    # bn_fc (eval) folded into the classifier.
    bnf_s = p['bnfc_gamma'] / jnp.sqrt(p['bnfc_var'] + EPS)
    bnf_t = p['bnfc_beta'] - p['bnfc_mean'] * bnf_s
    wcl = bnf_s[:, None] * p['cl_w'].T                            # (FC, C)
    bcl = p['cl_b'] + bnf_t @ p['cl_w'].T                         # (C,)

    wfc = p['fc_w'].T                                             # (F, FC)
    bfc = p['fc_b']                                               # (FC,)

    hbias = jnp.zeros((3, 3 * F), jnp.float32)
    hbias = hbias.at[0, :].set(bqkv)
    hbias = hbias.at[1, :FC].set(bfc)
    hbias = hbias.at[2, :C].set(bcl)

    # Attention additive mask (valid iff same batch element) + pooling matrix.
    r = jnp.arange(TB)
    mask = jnp.where((r[:, None] % B) == (r[None, :] % B),
                     0.0, -1e30).astype(jnp.float32)              # (TB, TB)
    sel = (((r[None, :] % B) == jnp.arange(B)[:, None])
           .astype(jnp.float32) / T)                              # (B, TB)

    return {'wih': wih, 'whh': whh, 'gvec': gvec, 'wqkv': wqkv, 'hbias': hbias,
            'mask': mask, 'sel': sel, 'wfc': wfc, 'wcl': wcl}


if __name__ == "__main__":
    key = jax.random.PRNGKey(0)
    k_p, k_x = jax.random.split(key)
    params = init_params(k_p)
    kparams = prepare_kernel_params(params)
    x = jax.random.normal(k_x, (BATCH, TIME_STEPS, INPUT_DIM), jnp.float32)

    logits = lstm_model_forward(x, kparams)
    logits = jax.block_until_ready(logits)

    assert logits.shape == (BATCH, NUM_CLASSES), logits.shape
    assert bool(jnp.all(jnp.isfinite(logits)))
    print("KERNEL_OK")
</pallas_src>

<mosaic_0001>
module attributes {stable_mosaic.version = 11 : i64} {
  func.func @_fused_kernel(%arg0: memref<16x16xf32, #tpu.memory_space<vmem>>, %arg1: memref<16x256xf32, #tpu.memory_space<vmem>>, %arg2: memref<64x256xf32, #tpu.memory_space<vmem>>, %arg3: memref<4x256xf32, #tpu.memory_space<vmem>>, %arg4: memref<64x192xf32, #tpu.memory_space<vmem>>, %arg5: memref<3x192xf32, #tpu.memory_space<vmem>>, %arg6: memref<16x16xf32, #tpu.memory_space<vmem>>, %arg7: memref<2x16xf32, #tpu.memory_space<vmem>>, %arg8: memref<64x32xf32, #tpu.memory_space<vmem>>, %arg9: memref<32x5xf32, #tpu.memory_space<vmem>>, %arg10: memref<2x5xf32, #tpu.memory_space<vmem>>) attributes {dimension_semantics = [], scalar_prefetch = 0 : i64, scratch_operands = 0 : i64, tpu.core_type = #tpu.core_type<tc>} {
    %c0 = arith.constant 0 : index
    %c0_0 = arith.constant 0 : index
    %0 = vector.load %arg3[%c0, %c0_0] : memref<4x256xf32, #tpu.memory_space<vmem>>, vector<4x256xf32>
    %1 = vector.extract_strided_slice %0 {offsets = [0, 0], sizes = [1, 256], strides = [1, 1]} : vector<4x256xf32> to vector<1x256xf32>
    %2 = vector.extract_strided_slice %0 {offsets = [1, 0], sizes = [1, 256], strides = [1, 1]} : vector<4x256xf32> to vector<1x256xf32>
    %3 = vector.extract_strided_slice %0 {offsets = [2, 0], sizes = [1, 256], strides = [1, 1]} : vector<4x256xf32> to vector<1x256xf32>
    %4 = vector.extract_strided_slice %0 {offsets = [3, 0], sizes = [1, 256], strides = [1, 1]} : vector<4x256xf32> to vector<1x256xf32>
    %cst = arith.constant 5.000000e-01 : f32
    %5 = vector.broadcast %cst : f32 to vector<1x256xf32>
    %6 = arith.cmpf ogt, %4, %5 : vector<1x256xf32>
    %c0_1 = arith.constant 0 : index
    %c0_2 = arith.constant 0 : index
    %7 = vector.load %arg2[%c0_1, %c0_2] : memref<64x256xf32, #tpu.memory_space<vmem>>, vector<64x256xf32>
    %c0_3 = arith.constant 0 : index
    %c0_4 = arith.constant 0 : index
    %8 = vector.load %arg0[%c0_3, %c0_4] : memref<16x16xf32, #tpu.memory_space<vmem>>, vector<16x16xf32>
    %c0_5 = arith.constant 0 : index
    %c0_6 = arith.constant 0 : index
    %9 = vector.load %arg1[%c0_5, %c0_6] : memref<16x256xf32, #tpu.memory_space<vmem>>, vector<16x256xf32>
    %cst_7 = arith.constant dense<0.000000e+00> : vector<16x256xf32>
    %10 = tpu.matmul %8, %9, %cst_7 {dimension_numbers = #tpu.dot_dimension_numbers<[1], [0], [0], [1], [0, 0, 1, 1], [], []>} : vector<16x16xf32>, vector<16x256xf32>, vector<16x256xf32> -> vector<16x256xf32>
    %11 = vector.broadcast %1 : vector<1x256xf32> to vector<16x256xf32>
    %12 = arith.addf %10, %11 : vector<16x256xf32>
    %cst_8 = arith.constant 0.000000e+00 : f32
    %13 = vector.broadcast %cst_8 : f32 to vector<2x64xf32>
    %cst_9 = arith.constant 0.000000e+00 : f32
    %14 = vector.broadcast %cst_9 : f32 to vector<2x64xf32>
    %15 = vector.extract_strided_slice %12 {offsets = [0, 0], sizes = [2, 256], strides = [1, 1]} : vector<16x256xf32> to vector<2x256xf32>
    %16 = vector.extract_strided_slice %12 {offsets = [14, 0], sizes = [2, 256], strides = [1, 1]} : vector<16x256xf32> to vector<2x256xf32>
    %17 = vector.shape_cast %6 : vector<1x256xi1> to vector<1x256xi1>
    %18 = vector.broadcast %17 : vector<1x256xi1> to vector<2x256xi1>
    %19 = arith.select %18, %15, %16 : vector<2x256xi1>, vector<2x256xf32>
    %cst_10 = arith.constant dense<0.000000e+00> : vector<2x256xf32>
    %20 = tpu.matmul %13, %7, %cst_10 {dimension_numbers = #tpu.dot_dimension_numbers<[1], [0], [0], [1], [0, 0, 1, 1], [], []>} : vector<2x64xf32>, vector<64x256xf32>, vector<2x256xf32> -> vector<2x256xf32>
    %21 = arith.addf %20, %19 : vector<2x256xf32>
    %22 = math.tanh %21 : vector<2x256xf32>
    %23 = vector.broadcast %2 : vector<1x256xf32> to vector<2x256xf32>
    %24 = arith.mulf %22, %23 : vector<2x256xf32>
    %25 = vector.broadcast %3 : vector<1x256xf32> to vector<2x256xf32>
    %26 = arith.addf %24, %25 : vector<2x256xf32>
    %27 = vector.extract_strided_slice %26 {offsets = [0, 0], sizes = [2, 64], strides = [1, 1]} : vector<2x256xf32> to vector<2x64xf32>
    %28 = vector.extract_strided_slice %26 {offsets = [0, 64], sizes = [2, 64], strides = [1, 1]} : vector<2x256xf32> to vector<2x64xf32>
    %29 = vector.extract_strided_slice %26 {offsets = [0, 128], sizes = [2, 64], strides = [1, 1]} : vector<2x256xf32> to vector<2x64xf32>
    %30 = vector.extract_strided_slice %26 {offsets = [0, 192], sizes = [2, 64], strides = [1, 1]} : vector<2x256xf32> to vector<2x64xf32>
    %31 = arith.mulf %28, %14 : vector<2x64xf32>
    %32 = arith.mulf %27, %30 : vector<2x64xf32>
    %33 = arith.addf %31, %32 : vector<2x64xf32>
    %34 = math.tanh %33 : vector<2x64xf32>
    %35 = arith.mulf %29, %34 : vector<2x64xf32>
    %36 = vector.extract_strided_slice %12 {offsets = [2, 0], sizes = [2, 256], strides = [1, 1]} : vector<16x256xf32> to vector<2x256xf32>
    %37 = vector.extract_strided_slice %12 {offsets = [12, 0], sizes = [2, 256], strides = [1, 1]} : vector<16x256xf32> to vector<2x256xf32>
    %38 = vector.shape_cast %6 : vector<1x256xi1> to vector<1x256xi1>
    %39 = vector.broadcast %38 : vector<1x256xi1> to vector<2x256xi1>
    %40 = arith.select %39, %36, %37 : vector<2x256xi1>, vector<2x256xf32>
    %cst_11 = arith.constant dense<0.000000e+00> : vector<2x256xf32>
    %41 = tpu.matmul %35, %7, %cst_11 {dimension_numbers = #tpu.dot_dimension_numbers<[1], [0], [0], [1], [0, 0, 1, 1], [], []>} : vector<2x64xf32>, vector<64x256xf32>, vector<2x256xf32> -> vector<2x256xf32>
    %42 = arith.addf %41, %40 : vector<2x256xf32>
    %43 = math.tanh %42 : vector<2x256xf32>
    %44 = vector.broadcast %2 : vector<1x256xf32> to vector<2x256xf32>
    %45 = arith.mulf %43, %44 : vector<2x256xf32>
    %46 = vector.broadcast %3 : vector<1x256xf32> to vector<2x256xf32>
    %47 = arith.addf %45, %46 : vector<2x256xf32>
    %48 = vector.extract_strided_slice %47 {offsets = [0, 0], sizes = [2, 64], strides = [1, 1]} : vector<2x256xf32> to vector<2x64xf32>
    %49 = vector.extract_strided_slice %47 {offsets = [0, 64], sizes = [2, 64], strides = [1, 1]} : vector<2x256xf32> to vector<2x64xf32>
    %50 = vector.extract_strided_slice %47 {offsets = [0, 128], sizes = [2, 64], strides = [1, 1]} : vector<2x256xf32> to vector<2x64xf32>
    %51 = vector.extract_strided_slice %47 {offsets = [0, 192], sizes = [2, 64], strides = [1, 1]} : vector<2x256xf32> to vector<2x64xf32>
    %52 = arith.mulf %49, %33 : vector<2x64xf32>
    %53 = arith.mulf %48, %51 : vector<2x64xf32>
    %54 = arith.addf %52, %53 : vector<2x64xf32>
    %55 = math.tanh %54 : vector<2x64xf32>
    %56 = arith.mulf %50, %55 : vector<2x64xf32>
    %57 = vector.extract_strided_slice %12 {offsets = [4, 0], sizes = [2, 256], strides = [1, 1]} : vector<16x256xf32> to vector<2x256xf32>
    %58 = vector.extract_strided_slice %12 {offsets = [10, 0], sizes = [2, 256], strides = [1, 1]} : vector<16x256xf32> to vector<2x256xf32>
    %59 = vector.shape_cast %6 : vector<1x256xi1> to vector<1x256xi1>
    %60 = vector.broadcast %59 : vector<1x256xi1> to vector<2x256xi1>
    %61 = arith.select %60, %57, %58 : vector<2x256xi1>, vector<2x256xf32>
    %cst_12 = arith.constant dense<0.000000e+00> : vector<2x256xf32>
    %62 = tpu.matmul %56, %7, %cst_12 {dimension_numbers = #tpu.dot_dimension_numbers<[1], [0], [0], [1], [0, 0, 1, 1], [], []>} : vector<2x64xf32>, vector<64x256xf32>, vector<2x256xf32> -> vector<2x256xf32>
    %63 = arith.addf %62, %61 : vector<2x256xf32>
    %64 = math.tanh %63 : vector<2x256xf32>
    %65 = vector.broadcast %2 : vector<1x256xf32> to vector<2x256xf32>
    %66 = arith.mulf %64, %65 : vector<2x256xf32>
    %67 = vector.broadcast %3 : vector<1x256xf32> to vector<2x256xf32>
    %68 = arith.addf %66, %67 : vector<2x256xf32>
    %69 = vector.extract_strided_slice %68 {offsets = [0, 0], sizes = [2, 64], strides = [1, 1]} : vector<2x256xf32> to vector<2x64xf32>
    %70 = vector.extract_strided_slice %68 {offsets = [0, 64], sizes = [2, 64], strides = [1, 1]} : vector<2x256xf32> to vector<2x64xf32>
    %71 = vector.extract_strided_slice %68 {offsets = [0, 128], sizes = [2, 64], strides = [1, 1]} : vector<2x256xf32> to vector<2x64xf32>
    %72 = vector.extract_strided_slice %68 {offsets = [0, 192], sizes = [2, 64], strides = [1, 1]} : vector<2x256xf32> to vector<2x64xf32>
    %73 = arith.mulf %70, %54 : vector<2x64xf32>
    %74 = arith.mulf %69, %72 : vector<2x64xf32>
    %75 = arith.addf %73, %74 : vector<2x64xf32>
    %76 = math.tanh %75 : vector<2x64xf32>
    %77 = arith.mulf %71, %76 : vector<2x64xf32>
    %78 = vector.extract_strided_slice %12 {offsets = [6, 0], sizes = [2, 256], strides = [1, 1]} : vector<16x256xf32> to vector<2x256xf32>
    %79 = vector.extract_strided_slice %12 {offsets = [8, 0], sizes = [2, 256], strides = [1, 1]} : vector<16x256xf32> to vector<2x256xf32>
    %80 = vector.shape_cast %6 : vector<1x256xi1> to vector<1x256xi1>
    %81 = vector.broadcast %80 : vector<1x256xi1> to vector<2x256xi1>
    %82 = arith.select %81, %78, %79 : vector<2x256xi1>, vector<2x256xf32>
    %cst_13 = arith.constant dense<0.000000e+00> : vector<2x256xf32>
    %83 = tpu.matmul %77, %7, %cst_13 {dimension_numbers = #tpu.dot_dimension_numbers<[1], [0], [0], [1], [0, 0, 1, 1], [], []>} : vector<2x64xf32>, vector<64x256xf32>, vector<2x256xf32> -> vector<2x256xf32>
    %84 = arith.addf %83, %82 : vector<2x256xf32>
    %85 = math.tanh %84 : vector<2x256xf32>
    %86 = vector.broadcast %2 : vector<1x256xf32> to vector<2x256xf32>
    %87 = arith.mulf %85, %86 : vector<2x256xf32>
    %88 = vector.broadcast %3 : vector<1x256xf32> to vector<2x256xf32>
    %89 = arith.addf %87, %88 : vector<2x256xf32>
    %90 = vector.extract_strided_slice %89 {offsets = [0, 0], sizes = [2, 64], strides = [1, 1]} : vector<2x256xf32> to vector<2x64xf32>
    %91 = vector.extract_strided_slice %89 {offsets = [0, 64], sizes = [2, 64], strides = [1, 1]} : vector<2x256xf32> to vector<2x64xf32>
    %92 = vector.extract_strided_slice %89 {offsets = [0, 128], sizes = [2, 64], strides = [1, 1]} : vector<2x256xf32> to vector<2x64xf32>
    %93 = vector.extract_strided_slice %89 {offsets = [0, 192], sizes = [2, 64], strides = [1, 1]} : vector<2x256xf32> to vector<2x64xf32>
    %94 = arith.mulf %91, %75 : vector<2x64xf32>
    %95 = arith.mulf %90, %93 : vector<2x64xf32>
    %96 = arith.addf %94, %95 : vector<2x64xf32>
    %97 = math.tanh %96 : vector<2x64xf32>
    %98 = arith.mulf %92, %97 : vector<2x64xf32>
    %99 = vector.extract_strided_slice %12 {offsets = [8, 0], sizes = [2, 256], strides = [1, 1]} : vector<16x256xf32> to vector<2x256xf32>
    %100 = vector.extract_strided_slice %12 {offsets = [6, 0], sizes = [2, 256], strides = [1, 1]} : vector<16x256xf32> to vector<2x256xf32>
    %101 = vector.shape_cast %6 : vector<1x256xi1> to vector<1x256xi1>
    %102 = vector.broadcast %101 : vector<1x256xi1> to vector<2x256xi1>
    %103 = arith.select %102, %99, %100 : vector<2x256xi1>, vector<2x256xf32>
    %cst_14 = arith.constant dense<0.000000e+00> : vector<2x256xf32>
    %104 = tpu.matmul %98, %7, %cst_14 {dimension_numbers = #tpu.dot_dimension_numbers<[1], [0], [0], [1], [0, 0, 1, 1], [], []>} : vector<2x64xf32>, vector<64x256xf32>, vector<2x256xf32> -> vector<2x256xf32>
    %105 = arith.addf %104, %103 : vector<2x256xf32>
    %106 = math.tanh %105 : vector<2x256xf32>
    %107 = vector.broadcast %2 : vector<1x256xf32> to vector<2x256xf32>
    %108 = arith.mulf %106, %107 : vector<2x256xf32>
    %109 = vector.broadcast %3 : vector<1x256xf32> to vector<2x256xf32>
    %110 = arith.addf %108, %109 : vector<2x256xf32>
    %111 = vector.extract_strided_slice %110 {offsets = [0, 0], sizes = [2, 64], strides = [1, 1]} : vector<2x256xf32> to vector<2x64xf32>
    %112 = vector.extract_strided_slice %110 {offsets = [0, 64], sizes = [2, 64], strides = [1, 1]} : vector<2x256xf32> to vector<2x64xf32>
    %113 = vector.extract_strided_slice %110 {offsets = [0, 128], sizes = [2, 64], strides = [1, 1]} : vector<2x256xf32> to vector<2x64xf32>
    %114 = vector.extract_strided_slice %110 {offsets = [0, 192], sizes = [2, 64], strides = [1, 1]} : vector<2x256xf32> to vector<2x64xf32>
    %115 = arith.mulf %112, %96 : vector<2x64xf32>
    %116 = arith.mulf %111, %114 : vector<2x64xf32>
    %117 = arith.addf %115, %116 : vector<2x64xf32>
    %118 = math.tanh %117 : vector<2x64xf32>
    %119 = arith.mulf %113, %118 : vector<2x64xf32>
    %120 = vector.extract_strided_slice %12 {offsets = [10, 0], sizes = [2, 256], strides = [1, 1]} : vector<16x256xf32> to vector<2x256xf32>
    %121 = vector.extract_strided_slice %12 {offsets = [4, 0], sizes = [2, 256], strides = [1, 1]} : vector<16x256xf32> to vector<2x256xf32>
    %122 = vector.shape_cast %6 : vector<1x256xi1> to vector<1x256xi1>
    %123 = vector.broadcast %122 : vector<1x256xi1> to vector<2x256xi1>
    %124 = arith.select %123, %120, %121 : vector<2x256xi1>, vector<2x256xf32>
    %cst_15 = arith.constant dense<0.000000e+00> : vector<2x256xf32>
    %125 = tpu.matmul %119, %7, %cst_15 {dimension_numbers = #tpu.dot_dimension_numbers<[1], [0], [0], [1], [0, 0, 1, 1], [], []>} : vector<2x64xf32>, vector<64x256xf32>, vector<2x256xf32> -> vector<2x256xf32>
    %126 = arith.addf %125, %124 : vector<2x256xf32>
    %127 = math.tanh %126 : vector<2x256xf32>
    %128 = vector.broadcast %2 : vector<1x256xf32> to vector<2x256xf32>
    %129 = arith.mulf %127, %128 : vector<2x256xf32>
    %130 = vector.broadcast %3 : vector<1x256xf32> to vector<2x256xf32>
    %131 = arith.addf %129, %130 : vector<2x256xf32>
    %132 = vector.extract_strided_slice %131 {offsets = [0, 0], sizes = [2, 64], strides = [1, 1]} : vector<2x256xf32> to vector<2x64xf32>
    %133 = vector.extract_strided_slice %131 {offsets = [0, 64], sizes = [2, 64], strides = [1, 1]} : vector<2x256xf32> to vector<2x64xf32>
    %134 = vector.extract_strided_slice %131 {offsets = [0, 128], sizes = [2, 64], strides = [1, 1]} : vector<2x256xf32> to vector<2x64xf32>
    %135 = vector.extract_strided_slice %131 {offsets = [0, 192], sizes = [2, 64], strides = [1, 1]} : vector<2x256xf32> to vector<2x64xf32>
    %136 = arith.mulf %133, %117 : vector<2x64xf32>
    %137 = arith.mulf %132, %135 : vector<2x64xf32>
    %138 = arith.addf %136, %137 : vector<2x64xf32>
    %139 = math.tanh %138 : vector<2x64xf32>
    %140 = arith.mulf %134, %139 : vector<2x64xf32>
    %141 = vector.extract_strided_slice %12 {offsets = [12, 0], sizes = [2, 256], strides = [1, 1]} : vector<16x256xf32> to vector<2x256xf32>
    %142 = vector.extract_strided_slice %12 {offsets = [2, 0], sizes = [2, 256], strides = [1, 1]} : vector<16x256xf32> to vector<2x256xf32>
    %143 = vector.shape_cast %6 : vector<1x256xi1> to vector<1x256xi1>
    %144 = vector.broadcast %143 : vector<1x256xi1> to vector<2x256xi1>
    %145 = arith.select %144, %141, %142 : vector<2x256xi1>, vector<2x256xf32>
    %cst_16 = arith.constant dense<0.000000e+00> : vector<2x256xf32>
    %146 = tpu.matmul %140, %7, %cst_16 {dimension_numbers = #tpu.dot_dimension_numbers<[1], [0], [0], [1], [0, 0, 1, 1], [], []>} : vector<2x64xf32>, vector<64x256xf32>, vector<2x256xf32> -> vector<2x256xf32>
    %147 = arith.addf %146, %145 : vector<2x256xf32>
    %148 = math.tanh %147 : vector<2x256xf32>
    %149 = vector.broadcast %2 : vector<1x256xf32> to vector<2x256xf32>
    %150 = arith.mulf %148, %149 : vector<2x256xf32>
    %151 = vector.broadcast %3 : vector<1x256xf32> to vector<2x256xf32>
    %152 = arith.addf %150, %151 : vector<2x256xf32>
    %153 = vector.extract_strided_slice %152 {offsets = [0, 0], sizes = [2, 64], strides = [1, 1]} : vector<2x256xf32> to vector<2x64xf32>
    %154 = vector.extract_strided_slice %152 {offsets = [0, 64], sizes = [2, 64], strides = [1, 1]} : vector<2x256xf32> to vector<2x64xf32>
    %155 = vector.extract_strided_slice %152 {offsets = [0, 128], sizes = [2, 64], strides = [1, 1]} : vector<2x256xf32> to vector<2x64xf32>
    %156 = vector.extract_strided_slice %152 {offsets = [0, 192], sizes = [2, 64], strides = [1, 1]} : vector<2x256xf32> to vector<2x64xf32>
    %157 = arith.mulf %154, %138 : vector<2x64xf32>
    %158 = arith.mulf %153, %156 : vector<2x64xf32>
    %159 = arith.addf %157, %158 : vector<2x64xf32>
    %160 = math.tanh %159 : vector<2x64xf32>
    %161 = arith.mulf %155, %160 : vector<2x64xf32>
    %162 = vector.extract_strided_slice %12 {offsets = [14, 0], sizes = [2, 256], strides = [1, 1]} : vector<16x256xf32> to vector<2x256xf32>
    %163 = vector.extract_strided_slice %12 {offsets = [0, 0], sizes = [2, 256], strides = [1, 1]} : vector<16x256xf32> to vector<2x256xf32>
    %164 = vector.shape_cast %6 : vector<1x256xi1> to vector<1x256xi1>
    %165 = vector.broadcast %164 : vector<1x256xi1> to vector<2x256xi1>
    %166 = arith.select %165, %162, %163 : vector<2x256xi1>, vector<2x256xf32>
    %cst_17 = arith.constant dense<0.000000e+00> : vector<2x256xf32>
    %167 = tpu.matmul %161, %7, %cst_17 {dimension_numbers = #tpu.dot_dimension_numbers<[1], [0], [0], [1], [0, 0, 1, 1], [], []>} : vector<2x64xf32>, vector<64x256xf32>, vector<2x256xf32> -> vector<2x256xf32>
    %168 = arith.addf %167, %166 : vector<2x256xf32>
    %169 = math.tanh %168 : vector<2x256xf32>
    %170 = vector.broadcast %2 : vector<1x256xf32> to vector<2x256xf32>
    %171 = arith.mulf %169, %170 : vector<2x256xf32>
    %172 = vector.broadcast %3 : vector<1x256xf32> to vector<2x256xf32>
    %173 = arith.addf %171, %172 : vector<2x256xf32>
    %174 = vector.extract_strided_slice %173 {offsets = [0, 0], sizes = [2, 64], strides = [1, 1]} : vector<2x256xf32> to vector<2x64xf32>
    %175 = vector.extract_strided_slice %173 {offsets = [0, 64], sizes = [2, 64], strides = [1, 1]} : vector<2x256xf32> to vector<2x64xf32>
    %176 = vector.extract_strided_slice %173 {offsets = [0, 128], sizes = [2, 64], strides = [1, 1]} : vector<2x256xf32> to vector<2x64xf32>
    %177 = vector.extract_strided_slice %173 {offsets = [0, 192], sizes = [2, 64], strides = [1, 1]} : vector<2x256xf32> to vector<2x64xf32>
    %178 = arith.mulf %175, %159 : vector<2x64xf32>
    %179 = arith.mulf %174, %177 : vector<2x64xf32>
    %180 = arith.addf %178, %179 : vector<2x64xf32>
    %181 = math.tanh %180 : vector<2x64xf32>
    %182 = arith.mulf %176, %181 : vector<2x64xf32>
    %183 = vector.extract_strided_slice %35 {offsets = [0, 0], sizes = [2, 32], strides = [1, 1]} : vector<2x64xf32> to vector<2x32xf32>
    %184 = vector.extract_strided_slice %182 {offsets = [0, 32], sizes = [2, 32], strides = [1, 1]} : vector<2x64xf32> to vector<2x32xf32>
    %185 = tpu.concatenate %183, %184 in 1 : vector<2x32xf32>, vector<2x32xf32> -> vector<2x64xf32>
    %186 = vector.extract_strided_slice %56 {offsets = [0, 0], sizes = [2, 32], strides = [1, 1]} : vector<2x64xf32> to vector<2x32xf32>
    %187 = vector.extract_strided_slice %161 {offsets = [0, 32], sizes = [2, 32], strides = [1, 1]} : vector<2x64xf32> to vector<2x32xf32>
    %188 = tpu.concatenate %186, %187 in 1 : vector<2x32xf32>, vector<2x32xf32> -> vector<2x64xf32>
    %189 = vector.extract_strided_slice %77 {offsets = [0, 0], sizes = [2, 32], strides = [1, 1]} : vector<2x64xf32> to vector<2x32xf32>
    %190 = vector.extract_strided_slice %140 {offsets = [0, 32], sizes = [2, 32], strides = [1, 1]} : vector<2x64xf32> to vector<2x32xf32>
    %191 = tpu.concatenate %189, %190 in 1 : vector<2x32xf32>, vector<2x32xf32> -> vector<2x64xf32>
    %192 = vector.extract_strided_slice %98 {offsets = [0, 0], sizes = [2, 32], strides = [1, 1]} : vector<2x64xf32> to vector<2x32xf32>
    %193 = vector.extract_strided_slice %119 {offsets = [0, 32], sizes = [2, 32], strides = [1, 1]} : vector<2x64xf32> to vector<2x32xf32>
    %194 = tpu.concatenate %192, %193 in 1 : vector<2x32xf32>, vector<2x32xf32> -> vector<2x64xf32>
    %195 = vector.extract_strided_slice %119 {offsets = [0, 0], sizes = [2, 32], strides = [1, 1]} : vector<2x64xf32> to vector<2x32xf32>
    %196 = vector.extract_strided_slice %98 {offsets = [0, 32], sizes = [2, 32], strides = [1, 1]} : vector<2x64xf32> to vector<2x32xf32>
    %197 = tpu.concatenate %195, %196 in 1 : vector<2x32xf32>, vector<2x32xf32> -> vector<2x64xf32>
    %198 = vector.extract_strided_slice %140 {offsets = [0, 0], sizes = [2, 32], strides = [1, 1]} : vector<2x64xf32> to vector<2x32xf32>
    %199 = vector.extract_strided_slice %77 {offsets = [0, 32], sizes = [2, 32], strides = [1, 1]} : vector<2x64xf32> to vector<2x32xf32>
    %200 = tpu.concatenate %198, %199 in 1 : vector<2x32xf32>, vector<2x32xf32> -> vector<2x64xf32>
    %201 = vector.extract_strided_slice %161 {offsets = [0, 0], sizes = [2, 32], strides = [1, 1]} : vector<2x64xf32> to vector<2x32xf32>
    %202 = vector.extract_strided_slice %56 {offsets = [0, 32], sizes = [2, 32], strides = [1, 1]} : vector<2x64xf32> to vector<2x32xf32>
    %203 = tpu.concatenate %201, %202 in 1 : vector<2x32xf32>, vector<2x32xf32> -> vector<2x64xf32>
    %204 = vector.extract_strided_slice %182 {offsets = [0, 0], sizes = [2, 32], strides = [1, 1]} : vector<2x64xf32> to vector<2x32xf32>
    %205 = vector.extract_strided_slice %35 {offsets = [0, 32], sizes = [2, 32], strides = [1, 1]} : vector<2x64xf32> to vector<2x32xf32>
    %206 = tpu.concatenate %204, %205 in 1 : vector<2x32xf32>, vector<2x32xf32> -> vector<2x64xf32>
    %207 = tpu.concatenate %185, %188, %191, %194, %197, %200, %203, %206 in 0 : vector<2x64xf32>, vector<2x64xf32>, vector<2x64xf32>, vector<2x64xf32>, vector<2x64xf32>, vector<2x64xf32>, vector<2x64xf32>, vector<2x64xf32> -> vector<16x64xf32>
    %c0_18 = arith.constant 0 : index
    %c0_19 = arith.constant 0 : index
    %208 = vector.load %arg5[%c0_18, %c0_19] : memref<3x192xf32, #tpu.memory_space<vmem>>, vector<3x192xf32>
    %c0_20 = arith.constant 0 : index
    %c0_21 = arith.constant 0 : index
    %209 = vector.load %arg4[%c0_20, %c0_21] : memref<64x192xf32, #tpu.memory_space<vmem>>, vector<64x192xf32>
    %cst_22 = arith.constant dense<0.000000e+00> : vector<16x192xf32>
    %210 = tpu.matmul %207, %209, %cst_22 {dimension_numbers = #tpu.dot_dimension_numbers<[1], [0], [0], [1], [0, 0, 1, 1], [], []>} : vector<16x64xf32>, vector<64x192xf32>, vector<16x192xf32> -> vector<16x192xf32>
    %211 = vector.extract_strided_slice %208 {offsets = [0, 0], sizes = [1, 192], strides = [1, 1]} : vector<3x192xf32> to vector<1x192xf32>
    %212 = vector.broadcast %211 : vector<1x192xf32> to vector<16x192xf32>
    %213 = arith.addf %210, %212 : vector<16x192xf32>
    %214 = vector.extract_strided_slice %213 {offsets = [0, 0], sizes = [16, 64], strides = [1, 1]} : vector<16x192xf32> to vector<16x64xf32>
    %215 = vector.extract_strided_slice %213 {offsets = [0, 64], sizes = [16, 64], strides = [1, 1]} : vector<16x192xf32> to vector<16x64xf32>
    %216 = vector.extract_strided_slice %213 {offsets = [0, 128], sizes = [16, 64], strides = [1, 1]} : vector<16x192xf32> to vector<16x64xf32>
    %cst_23 = arith.constant dense<0.000000e+00> : vector<16x16xf32>
    %217 = tpu.matmul %214, %215, %cst_23 {dimension_numbers = #tpu.dot_dimension_numbers<[1], [1], [0], [0], [0, 0, 1, 0], [], []>} : vector<16x64xf32>, vector<16x64xf32>, vector<16x16xf32> -> vector<16x16xf32>
    %c0_24 = arith.constant 0 : index
    %c0_25 = arith.constant 0 : index
    %218 = vector.load %arg6[%c0_24, %c0_25] : memref<16x16xf32, #tpu.memory_space<vmem>>, vector<16x16xf32>
    %219 = arith.addf %217, %218 : vector<16x16xf32>
    %cst_26 = arith.constant dense<0xFF800000> : vector<16xf32>
    %220 = vector.multi_reduction <maximumf>, %219, %cst_26 [1] : vector<16x16xf32> to vector<16xf32>
    %221 = vector.shape_cast %220 : vector<16xf32> to vector<16x1xf32>
    %222 = vector.broadcast %221 : vector<16x1xf32> to vector<16x16xf32>
    %223 = arith.subf %219, %222 : vector<16x16xf32>
    %224 = math.exp %223 : vector<16x16xf32>
    %cst_27 = arith.constant dense<0.000000e+00> : vector<16xf32>
    %225 = vector.multi_reduction <add>, %224, %cst_27 [1] : vector<16x16xf32> to vector<16xf32>
    %226 = vector.shape_cast %225 : vector<16xf32> to vector<16x1xf32>
    %227 = vector.broadcast %226 : vector<16x1xf32> to vector<16x16xf32>
    %228 = arith.divf %224, %227 : vector<16x16xf32>
    %c0_28 = arith.constant 0 : index
    %c0_29 = arith.constant 0 : index
    %229 = vector.load %arg7[%c0_28, %c0_29] : memref<2x16xf32, #tpu.memory_space<vmem>>, vector<2x16xf32>
    %cst_30 = arith.constant dense<0.000000e+00> : vector<2x16xf32>
    %230 = tpu.matmul %229, %228, %cst_30 {dimension_numbers = #tpu.dot_dimension_numbers<[1], [0], [0], [1], [0, 0, 1, 1], [], []>} : vector<2x16xf32>, vector<16x16xf32>, vector<2x16xf32> -> vector<2x16xf32>
    %cst_31 = arith.constant dense<0.000000e+00> : vector<2x64xf32>
    %231 = tpu.matmul %230, %216, %cst_31 {dimension_numbers = #tpu.dot_dimension_numbers<[1], [0], [0], [1], [0, 0, 1, 1], [], []>} : vector<2x16xf32>, vector<16x64xf32>, vector<2x64xf32> -> vector<2x64xf32>
    %c0_32 = arith.constant 0 : index
    %c0_33 = arith.constant 0 : index
    %232 = vector.load %arg8[%c0_32, %c0_33] : memref<64x32xf32, #tpu.memory_space<vmem>>, vector<64x32xf32>
    %cst_34 = arith.constant dense<0.000000e+00> : vector<2x32xf32>
    %233 = tpu.matmul %231, %232, %cst_34 {dimension_numbers = #tpu.dot_dimension_numbers<[1], [0], [0], [1], [0, 0, 1, 1], [], []>} : vector<2x64xf32>, vector<64x32xf32>, vector<2x32xf32> -> vector<2x32xf32>
    %234 = vector.extract_strided_slice %208 {offsets = [1, 0], sizes = [1, 32], strides = [1, 1]} : vector<3x192xf32> to vector<1x32xf32>
    %235 = vector.broadcast %234 : vector<1x32xf32> to vector<2x32xf32>
    %236 = arith.addf %233, %235 : vector<2x32xf32>
    %cst_35 = arith.constant 0.000000e+00 : f32
    %237 = vector.broadcast %cst_35 : f32 to vector<2x32xf32>
    %238 = arith.maximumf %236, %237 : vector<2x32xf32>
    %c0_36 = arith.constant 0 : index
    %c0_37 = arith.constant 0 : index
    %239 = vector.load %arg9[%c0_36, %c0_37] : memref<32x5xf32, #tpu.memory_space<vmem>>, vector<32x5xf32>
    %cst_38 = arith.constant dense<0.000000e+00> : vector<2x5xf32>
    %240 = tpu.matmul %238, %239, %cst_38 {dimension_numbers = #tpu.dot_dimension_numbers<[1], [0], [0], [1], [0, 0, 1, 1], [], []>} : vector<2x32xf32>, vector<32x5xf32>, vector<2x5xf32> -> vector<2x5xf32>
    %241 = vector.extract_strided_slice %208 {offsets = [2, 0], sizes = [1, 5], strides = [1, 1]} : vector<3x192xf32> to vector<1x5xf32>
    %242 = vector.broadcast %241 : vector<1x5xf32> to vector<2x5xf32>
    %243 = arith.addf %240, %242 : vector<2x5xf32>
    %c0_39 = arith.constant 0 : index
    %c0_40 = arith.constant 0 : index
    %244 = vector.load %arg10[%c0_39, %c0_40] : memref<2x5xf32, #tpu.memory_space<vmem>>, vector<2x5xf32>
    tpu.vector_store %arg10[%c0_39, %c0_40], %243 {strides = array<i32>} : memref<2x5xf32, #tpu.memory_space<vmem>>, vector<2x5xf32>,
    return
  }
}

</mosaic_0001>

<bundles_post_ra>
// kernel: lstm_model_forward.1
= control target key start
LH: loop header
LB: loop body
LE: loop exit
PB: predicated region body
PF: predicated region fallthrough
CT: control target
= control target key end

     0   :  { %15 = vsyncpa [#allocation3], 0  ;;  %s2557_s0 = inlined_call_operand.vmem [shape: f32[16,16], index: 0, kind: input, shape index: {}]   ;;  %s2558_s1 = inlined_call_operand.vmem [shape: f32[16,256], index: 1, kind: input, shape index: {}]   ;;  %s2559_s2 = inlined_call_operand.vmem [shape: f32[64,256], index: 2, kind: input, shape index: {}]   ;;  %s2560_s3 = inlined_call_operand.vmem [shape: f32[4,256], index: 3, kind: input, shape index: {}]   ;;  %s2561_s4 = inlined_call_operand.hbm [shape: f32[64,192], index: 4, kind: input, shape index: {}]   ;;  %s2562_s5 = inlined_call_operand.hbm [shape: f32[3,192], index: 5, kind: input, shape index: {}]   ;;  %s2563_s6 = inlined_call_operand.vmem [shape: f32[16,16], index: 6, kind: input, shape index: {}]   ;;  %s2564_s7 = inlined_call_operand.hbm [shape: f32[2,16], index: 7, kind: input, shape index: {}]   ;;  %s2565_s8 = inlined_call_operand.vmem [shape: f32[64,32], index: 8, kind: input, shape index: {}]   ;;  %s2566_s9 = inlined_call_operand.vmem [shape: f32[32,5], index: 9, kind: input, shape index: {}]   ;;  %s2567_s10 = inlined_call_operand.hbm [shape: f32[2,5], index: 10, kind: output, shape index: {}]  }
   0x1   :  { %16 = vsyncpa [#allocation6], 0 }
   0x2   :  { %17 = vsyncpa [#allocation4], 0  ;;  %s1938_s13 = smov [#allocation5]   ;;  %s1939_s15 = smov [#allocation2]  }
   0x3   :  { %s44_s14 = sshll.u32 %s1938_s13, 4  ;;  %s31_s16 = sshll.u32 %s1939_s15, 4  ;;  %s45_s14 = int_to_ptr.vmem [resolvable:$true] %s44_s14  ;;  %s32_s16 = int_to_ptr.vmem [resolvable:$true] %s31_s16 }
   0x4   :  { %s1860_s17 = scalar_lea.vmem %s45_s14, 128  ;;  %p1865_p1 = scmp.lt.s32.totalorder %s45_s14, %s45_s14 }
   0x5   :  { %p1861_p0 = scmp.ne.s32.totalorder %s45_s14, %s1860_s17  ;;  %p1866_p2 = scmp.lt.s32.totalorder %s1860_s17, %s1860_s17 }
   0x7   :  { %p1867_p3 = por %p1866_p2, %p1865_p1 }
   0x9   :  { %p1868_p4 = pnand %p1867_p3, %p1861_p0 }
   0xb   :  { %1871 = shalt.err (!%p1868_p4)
}
   0xc   :  { %47 = dma.hbm_to_vmem [thread:$0]  %s2562_s5, 128, %s45_s14, [#allocation6]  }
   0xd   :  { %s1880_s20 = scalar_lea.vmem %s32_s16, 2048  ;;  %p1885_p6 = scmp.lt.s32.totalorder %s32_s16, %s32_s16 }
   0xe   :  { %p1881_p5 = scmp.ne.s32.totalorder %s32_s16, %s1880_s20  ;;  %p1886_p7 = scmp.lt.s32.totalorder %s1880_s20, %s1880_s20 }
  0x10   :  { %p1887_p8 = por %p1886_p7, %p1885_p6 }
  0x12   :  { %p1888_p9 = pnand %p1887_p8, %p1881_p5 }
  0x14   :  { %1891 = shalt.err (!%p1888_p9)
}
  0x15   :  { %s1940_s21 = smov 256   ;;  %s1941_s22 = smov 16  }
  0x16   :  { %37 = dma.hbm_to_vmem [thread:$0]  %s2561_s4, 2048, %s32_s16, [#allocation3], %s1940_s21, %s1940_s21, %s1941_s22  }
  0x17   :  { %s1942_s25 = smov [#allocation7]  }
  0x18   :  { %s56_s26 = sshll.u32 %s1942_s25, 4  ;;  %s57_s26 = int_to_ptr.vmem [resolvable:$true] %s56_s26 }
  0x19   :  { %s1900_s27 = scalar_lea.vmem %s57_s26, 32  ;;  %p1905_p11 = scmp.lt.s32.totalorder %s57_s26, %s57_s26 }
  0x1a   :  { %p1901_p10 = scmp.ne.s32.totalorder %s57_s26, %s1900_s27  ;;  %p1906_p12 = scmp.lt.s32.totalorder %s1900_s27, %s1900_s27 }
  0x1c   :  { %p1907_p13 = por %p1906_p12, %p1905_p11 }
  0x1e   :  { %p1908_p0 = pnand %p1907_p13, %p1901_p10 }
  0x20   :  { %1911 = shalt.err (!%p1908_p0)
}
  0x21   :  { %59 = dma.hbm_to_vmem [thread:$0]  %s2564_s7, 32, %s57_s26, [#allocation6]  }
  0x22   :  { %1932 = dma.done.wait [#allocation3], 2048  }
  0x23   :  { %1933 = vsyncadd [#allocation3], 4294965248 }
  0x24   :  { %1934 = dma.done.wait [#allocation6], 160  }
  0x25   :  { %1935 = vsyncadd [#allocation6], 4294967136  ;;  %v1943_v0 = vmov 0.0   ;;  %v96_v1 = vld [vmem:[%s2558_s1 + $0x18] sm:$0xff]  ;;  %v95_v3 = vld [vmem:[%s2558_s1 + $0x10] sm:$0xff]  ;;  %vm116_vm0 = vcmask 130048   ;;  %v98_v23 = vlaneseq }
  0x26   :  { %187 = vmatprep.mubr.f32.mxu0 %v1943_v0  ;;  %295 = vmatprep.mubr.f32.mxu1 %v1943_v0  ;;  %v2020_v2 = vld [vmem:[%s2559_s2 + $0x78] sm:$0xff]  ;;  %v2029_v4 = vld [vmem:[%s2559_s2 + $0x70] sm:$0xff]  ;;  %v94_v5 = vld [vmem:[%s2558_s1 + $0x8] sm:$0xff]  ;;  %v1944_v27 = vmov 0   ;;  %vm227_vm4 = vcmask 523264   ;;  %vm1092_vm5 = vcmask 261120  }
  0x27   :  { %151 = vmatprep.subr.mxu0 %v96_v1  ;;  %247 = vmatprep.subr.mxu1 %v2020_v2  ;;  %v2037_v6 = vld [vmem:[%s2559_s2 + $0x68] sm:$0xff]  ;;  %v93_v7 = vld [vmem:[%s2558_s1] sm:$0xff]  ;;  %v2055_v10 = vld [vmem:[%s2559_s2 + $0x58] sm:$0xff]  ;;  %v2173_v25 = vshrl.u32 %v98_v23, 7  ;;  %vm1119_vm6 = vcmask 1041408   ;;  %vm1121_vm7 = vcmask 1043456  }
  0x28   :  { %152 = vmatpush1.msra.mxu0 %v95_v3  ;;  %248 = vmatpush1.msra.mxu1 %v2029_v4  ;;  %v2046_v8 = vld [vmem:[%s2559_s2 + $0x60] sm:$0xff]  ;;  %v2060_v11 = vld [vmem:[%s2559_s2 + $0x50] sm:$0xff]  ;;  %v2066_v12 = vld [vmem:[%s2559_s2 + $0x48] sm:$0xff]  ;;  %vm1123_vm8 = vcmask 1045504   ;;  %vm1946_vm9 = vmmov 0   ;;  %vm1674_vm10 = vcmask 33792  }
  0x29   :  { %v91_v9 = vld [vmem:[%s2557_s0] sm:$0xff]  ;;  %153 = vmatprep.subr.mxu0 %v94_v5  ;;  %249 = vmatprep.subr.mxu1 %v2037_v6  ;;  %v92_v14 = vld [vmem:[%s2557_s0 + $0x8] sm:$0xff]  ;;  %v2083_v15 = vld [vmem:[%s2559_s2 + $0x38] sm:$0xff]  ;;  %v203_v26 = vsub.s32 3, %v2173_v25  ;;  %v2178_v31 = vsub.s32 0, %v2173_v25  ;;  %v104_v32 = vsub.s32 4, %v2173_v25 }
  0x2a   :  { %154 = vmatpush1.msra.mxu0 %v93_v7  ;;  %250 = vmatpush1.msra.mxu1 %v2046_v8  ;;  %v2073_v13 = vld [vmem:[%s2559_s2 + $0x40] sm:$0xff]  ;;  %v2089_v16 = vld [vmem:[%s2559_s2 + $0x30] sm:$0xff]  ;;  %v2096_v17 = vld [vmem:[%s2559_s2 + $0x28] sm:$0xff]  ;;  %v207_v34 = vsub.s32 7, %v2173_v25  ;;  %v330_v23 = vsub.s32 6, %v2173_v25 }
  0x2b   :  { %1692 = vmatmul.mubr.msk.f32.vlgmr.msra.gmra.mxu0 %vm116_vm0, %v91_v9  ;;  %251 = vmatprep.subr.mxu1 %v2055_v10  ;;  %v2104_v18 = vld [vmem:[%s2559_s2 + $0x20] sm:$0xff]  ;;  %v2110_v19 = vld [vmem:[%s2559_s2 + $0x18] sm:$0xff]  ;;  %v2117_v20 = vld [vmem:[%s2559_s2 + $0x10] sm:$0xff] }
  0x2c   :  { %252 = vmatpush1.msra.mxu1 %v2060_v11  ;;  %193 = vmatprep.mubr.f32.mxu0 %v1943_v0  ;;  %v2124_v21 = vld [vmem:[%s2559_s2 + $0x8] sm:$0xff]  ;;  %v2131_v22 = vld [vmem:[%s2559_s2] sm:$0xff] }
  0x2d   :  { %253 = vmatprep.subr.mxu1 %v2066_v12  ;;  %392 = vmatprep.subr.mxu0 %v2020_v2  ;;  %v2171_v24 = vld [vmem:[%s2560_s3] sm:$0xff]  ;;  %s1945_s3 = smov 64  }
  0x2e   :  { %254 = vmatpush1.msra.mxu1 %v2073_v13  ;;  %393 = vmatpush1.msra.mxu0 %v2029_v4  ;;  %vm74_vm1 = vcmp.gt.f32.partialorder %v2171_v24, 0.5  ;;  %v101_v33 = vrot.slane %v2171_v24, %v2178_v31  ;;  %v105_v35 = vrot.slane %v2171_v24, %v104_v32 }
  0x2f   :  { %1693 = vmatmul.mubr.msk.f32.gmra.mxu0 %vm116_vm0, %v92_v14  ;;  %255 = vmatprep.subr.mxu1 %v2083_v15  ;;  %v200_v28 = vsel %vm74_vm1, 1, %v1944_v27  ;;  %v310_v14 = vsub.s32 5, %v2173_v25  ;;  %v2223_v27 = vsub.s32 1, %v2173_v25 }
  0x30   :  { %256 = vmatpush1.msra.mxu1 %v2089_v16  ;;  %394 = vmatprep.subr.mxu0 %v2037_v6  ;;  %v204_v29 = vrot.slane %v200_v28, %v203_v26  ;;  %v111_v36 = vrot.slane %v101_v33, %v2178_v31  ;;  %v208_v37 = vrot.slane %v200_v28, %v207_v34 }
  0x31   :  { %257 = vmatprep.subr.mxu1 %v2096_v17  ;;  %395 = vmatpush1.msra.mxu0 %v2046_v8  ;;  %v115_v38 = vrot.slane %v105_v35, %v2178_v31  ;;  %v331_v28 = vrot.slane %v2171_v24, %v330_v23 }
  0x32   :  { %258 = vmatpush1.msra.mxu1 %v2104_v18  ;;  %396 = vmatprep.subr.mxu0 %v2055_v10  ;;  %v212_v30 = vrot.slane %v204_v29, %v203_v26  ;;  %v216_v42 = vrot.slane %v208_v37, %v203_v26  ;;  %v311_v26 = vrot.slane %v2171_v24, %v310_v14 }
  0x33   :  { %259 = vmatprep.subr.mxu1 %v2110_v19  ;;  %397 = vmatpush1.msra.mxu0 %v2060_v11  ;;  %v307_v37 = vrot.slane %v2171_v24, %v2223_v27 }
  0x34   :  { %260 = vmatpush1.msra.mxu1 %v2117_v20  ;;  %398 = vmatprep.subr.mxu0 %v2066_v12  ;;  %vm217_vm2 = vcmp.eq.s32.totalorder %v212_v30, 1  ;;  %vm2189_vm3 = vcmp.eq.s32.totalorder %v216_v42, 1  ;;  %v2227_v29 = vrot.slane %v311_v26, %v2223_v27  ;;  %v2230_v30 = vsub.s32 2, %v2173_v25  ;;  %v1514_v25 = vld [vmem:[%s2565_s8 + $0x38] sm:$0xff] }
  0x35   :  { %261 = vmatprep.subr.mxu1 %v2124_v21  ;;  %399 = vmatpush1.msra.mxu0 %v2073_v13 }
  0x36   :  { %262 = vmatpush1.msra.mxu1 %v2131_v22  ;;  %400 = vmatprep.subr.mxu0 %v2083_v15  ;;  %v2233_v33 = vrot.slane %v331_v28, %v2230_v30 }
  0x37   :  { %296 = vmatmul.mubr.f32.vlgmr.msra.gmra.mxu1 %v1943_v0  ;;  %401 = vmatpush1.msra.mxu0 %v2089_v16 }
  0x38   :  { %402 = vmatprep.subr.mxu0 %v2096_v17  ;;  %440 = vmatprep.mubr.f32.mxu0 %v1943_v0 }
  0x39   :  { %403 = vmatpush1.msra.mxu0 %v2104_v18  ;;  %495 = vmatprep.subr.mxu1 %v2020_v2 }
  0x3a   :  { %404 = vmatprep.subr.mxu0 %v2110_v19  ;;  %496 = vmatpush1.msra.mxu1 %v2029_v4 }
  0x3b   :  { %405 = vmatpush1.msra.mxu0 %v2117_v20  ;;  %497 = vmatprep.subr.mxu1 %v2037_v6 }
  0x3c   :  { %406 = vmatprep.subr.mxu0 %v2124_v21  ;;  %498 = vmatpush1.msra.mxu1 %v2046_v8 }
  0x3d   :  { %407 = vmatpush1.msra.mxu0 %v2131_v22  ;;  %499 = vmatprep.subr.mxu1 %v2055_v10 }
  0x3e   :  { %500 = vmatpush1.msra.mxu1 %v2060_v11  ;;  %543 = vmatprep.mubr.f32.mxu1 %v1943_v0 }
  0x3f   :  { %501 = vmatprep.subr.mxu1 %v2066_v12  ;;  %596 = vmatprep.subr.mxu0 %v2020_v2 }
  0x40   :  { %502 = vmatpush1.msra.mxu1 %v2073_v13 }
  0x41   :  { %503 = vmatprep.subr.mxu1 %v2083_v15 }
  0x42   :  { %504 = vmatpush1.msra.mxu1 %v2089_v16 }
  0x43   :  { %505 = vmatprep.subr.mxu1 %v2096_v17 }
  0x44   :  { %506 = vmatpush1.msra.mxu1 %v2104_v18 }
  0x45   :  { %507 = vmatprep.subr.mxu1 %v2110_v19 }
  0x46   :  { %508 = vmatpush1.msra.mxu1 %v2117_v20 }
  0x47   :  { %509 = vmatprep.subr.mxu1 %v2124_v21 }
  0x48   :  { %510 = vmatpush1.msra.mxu1 %v2131_v22 }
  0x49   :  { %701 = vmatprep.subr.mxu1 %v2020_v2 }
  0xeb   :  { %v189_v39 = vpop.f32.mrf.mxu0 }
  0xec   :  { %v190_v40 = vadd.f32 %v189_v39, %v111_v36  ;;  %v327_v39 = vrot.slane %v2171_v24, %v2230_v30 }
  0xed   :  { %v191_v41 = vpop.f32.mrf.mxu0 }
  0xee   :  { %v192_v43 = vadd.f32 %v191_v41, %v115_v38  ;;  %v676_v44 = vrot.slane %v190_v40, 6  ;;  %v779_v46 = vrot.slane %v190_v40, 2  ;;  %v2246_v41 = vrot.slane %v327_v39, %v2230_v30 }
  0xef   :  { %v195_v45 = vpop.f32.mrf.mxu0 }
  0xf0   :  { %v196_v47 = vadd.f32 %v195_v45, %v111_v36  ;;  %v677_v50 = vrot.slane %v192_v43, 6  ;;  %v780_v51 = vrot.slane %v192_v43, 2 }
  0xf1   :  { %v197_v48 = vpop.f32.mrf.mxu0 }
  0xf2   :  { %v198_v52 = vadd.f32 %v197_v48, %v115_v38  ;;  %v221_v53 = vrot.slane %v196_v47, 6  ;;  %v361_v54 = vrot.slane %v196_v47, 2  ;;  %v2193_v55 = vsel %vm217_vm2, %v196_v47, %v676_v44 }
  0xf3   :  { %v2195_v56 = vsel %vm217_vm2, %v196_v47, %v779_v46  ;;  %v2241_v38 = vrot.slane %v307_v37, %v2223_v27 }
  0xf4   :  { %v2197_v57 = vsel %vm217_vm2, %v190_v40, %v221_v53  ;;  %v2199_v58 = vsel %vm217_vm2, %v190_v40, %v361_v54  ;;  %v362_v59 = vrot.slane %v198_v52, 2  ;;  %v222_v60 = vrot.slane %v198_v52, 6 }
  0xf5   :  { %v2203_v61 = vsel %vm2189_vm3, %v198_v52, %v677_v50  ;;  %v2211_v63 = vsel %vm2189_vm3, %v198_v52, %v780_v51  ;;  %v369_v51 = vrot.slane %v2199_v58, 2 }
  0xf6   :  { %v2207_v62 = vsel %vm2189_vm3, %v192_v43, %v362_v59  ;;  %v2216_v5 = vsel %vm2189_vm3, %v192_v43, %v222_v60 }
  0xf7   :  { %v297_v1 = vpop.f32.mrf.mxu1  ;;  %v370_v54 = vrot.slane %v2207_v62, 2 }
  0xf8   :  { %v298_v3 = vadd.f32 %v297_v1, %v2197_v57 }
  0xf9   :  { %v299_v7 = vpop.f32.mrf.mxu1 }
  0xfa   :  { %v300_v9 = vadd.f32 %v299_v7, %v2216_v5 }
  0xfc   :  { %1796 = vtanh.f32 %v300_v9 }
  0xfd   :  { %1798 = vtanh.f32 %v298_v3 }
 0x109   :  { %v1797_v34 = vpop.eup %1796 }
 0x10a   :  { %v323_v35 = vmul.f32 %v1797_v34, %v2227_v29  ;;  %v1799_v40 = vpop.eup %1798 }
 0x10b   :  { %v322_v42 = vmul.f32 %v1799_v40, %v2241_v38 }
 0x10c   :  { %v343_v36 = vadd.f32 %v2233_v33, %v323_v35 }
 0x10d   :  { %v342_v43 = vadd.f32 %v2246_v41, %v322_v42  ;;  %v472_v42 = vrot.slane %v2197_v57, 4 }
 0x10e   :  { %346 = vrot.lane.b32.xlu0 %v343_v36, %s1945_s3 }
 0x10f   :  { %v344_v46 = vmul.f32 0.0, %v342_v43 }
 0x180   :  { %v347_v44 = vpop.permute.xlu0 %346 }
 0x181   :  { %v349_v45 = vmul.f32 %v347_v44, %v342_v43 }
 0x183   :  { %351 = vrot.lane.b32.xlu0 %v349_v45, %s1945_s3  ;;  %v473_v45 = vrot.slane %v2216_v5, 4 }
 0x1f5   :  { %v352_v47 = vpop.permute.xlu0 %351 }
 0x1f6   :  { %v354_v48 = vadd.f32 %v352_v47, %v344_v46 }
 0x1f8   :  { %1800 = vtanh.f32 %v354_v48 }
 0x205   :  { %v1801_v49 = vpop.eup %1800 }
 0x206   :  { %357 = vrot.lane.b32.xlu1 %v1801_v49, %s1945_s3 }
 0x278   :  { %v358_v24 = vpop.permute.xlu1 %357 }
 0x279   :  { %v2252_v50 = vmul.f32 %v358_v24, %v343_v36 }
 0x27b   :  { %1694 = vmatmul.mubr.msk.f32.vlgmr.msra.gmra.mxu0 %vm227_vm4, %v2252_v50 }
 0x27c   :  { %597 = vmatpush1.msra.mxu0 %v2029_v4  ;;  %644 = vmatprep.mubr.f32.mxu0 %v1943_v0 }
 0x27d   :  { %598 = vmatprep.subr.mxu0 %v2037_v6 }
 0x27e   :  { %599 = vmatpush1.msra.mxu0 %v2046_v8 }
 0x27f   :  { %600 = vmatprep.subr.mxu0 %v2055_v10 }
 0x280   :  { %601 = vmatpush1.msra.mxu0 %v2060_v11 }
 0x281   :  { %602 = vmatprep.subr.mxu0 %v2066_v12 }
 0x282   :  { %603 = vmatpush1.msra.mxu0 %v2073_v13 }
 0x283   :  { %604 = vmatprep.subr.mxu0 %v2083_v15 }
 0x284   :  { %605 = vmatpush1.msra.mxu0 %v2089_v16 }
 0x285   :  { %606 = vmatprep.subr.mxu0 %v2096_v17 }
 0x286   :  { %607 = vmatpush1.msra.mxu0 %v2104_v18 }
 0x287   :  { %608 = vmatprep.subr.mxu0 %v2110_v19 }
 0x288   :  { %609 = vmatpush1.msra.mxu0 %v2117_v20 }
 0x289   :  { %610 = vmatprep.subr.mxu0 %v2124_v21 }
 0x28a   :  { %611 = vmatpush1.msra.mxu0 %v2131_v22 }
 0x28b   :  { %810 = vmatprep.subr.mxu0 %v2020_v2 }
 0x33b   :  { %v442_v52 = vpop.f32.mrf.mxu0 }
 0x33c   :  { %v443_v53 = vadd.f32 %v442_v52, %v369_v51 }
 0x33d   :  { %v444_v59 = vpop.f32.mrf.mxu0 }
 0x33e   :  { %v445_v60 = vadd.f32 %v444_v59, %v370_v54 }
 0x340   :  { %1802 = vtanh.f32 %v445_v60 }
 0x341   :  { %1804 = vtanh.f32 %v443_v53 }
 0x34d   :  { %v1803_v1 = vpop.eup %1802 }
 0x34e   :  { %v450_v3 = vmul.f32 %v1803_v1, %v2227_v29  ;;  %v1805_v9 = vpop.eup %1804 }
 0x34f   :  { %v449_v14 = vmul.f32 %v1805_v9, %v2241_v38  ;;  %v573_v9 = vrot.slane %v2199_v58, 6 }
 0x350   :  { %v452_v7 = vadd.f32 %v450_v3, %v2233_v33 }
 0x351   :  { %v451_v23 = vadd.f32 %v449_v14, %v2246_v41 }
 0x352   :  { %455 = vrot.lane.b32.xlu1 %v452_v7, %s1945_s3 }
 0x353   :  { %v453_v34 = vmul.f32 %v451_v23, %v354_v48 }
 0x3c4   :  { %v456_v26 = vpop.permute.xlu1 %455 }
 0x3c5   :  { %v458_v28 = vmul.f32 %v456_v26, %v451_v23  ;;  %v574_v26 = vrot.slane %v2207_v62, 6 }
 0x3c7   :  { %460 = vrot.lane.b32.xlu0 %v458_v28, %s1945_s3 }
 0x439   :  { %v461_v35 = vpop.permute.xlu0 %460 }
 0x43a   :  { %v463_v36 = vadd.f32 %v461_v35, %v453_v34 }
 0x43c   :  { %1806 = vtanh.f32 %v463_v36 }
 0x449   :  { %v1807_v37 = vpop.eup %1806 }
 0x44a   :  { %466 = vrot.lane.b32.xlu1 %v1807_v37, %s1945_s3 }
 0x4bc   :  { %v467_v39 = vpop.permute.xlu1 %466 }
 0x4bd   :  { %v2282_v40 = vmul.f32 %v467_v39, %v452_v7 }
 0x4bf   :  { %1695 = vmatmul.mubr.msk.f32.vlgmr.msra.gmra.mxu1 %vm227_vm4, %v2282_v40 }
 0x4c0   :  { %702 = vmatpush1.msra.mxu1 %v2029_v4  ;;  %749 = vmatprep.mubr.f32.mxu1 %v1943_v0 }
 0x4c1   :  { %703 = vmatprep.subr.mxu1 %v2037_v6 }
 0x4c2   :  { %704 = vmatpush1.msra.mxu1 %v2046_v8 }
 0x4c3   :  { %705 = vmatprep.subr.mxu1 %v2055_v10 }
 0x4c4   :  { %706 = vmatpush1.msra.mxu1 %v2060_v11 }
 0x4c5   :  { %707 = vmatprep.subr.mxu1 %v2066_v12 }
 0x4c6   :  { %708 = vmatpush1.msra.mxu1 %v2073_v13 }
 0x4c7   :  { %709 = vmatprep.subr.mxu1 %v2083_v15 }
 0x4c8   :  { %710 = vmatpush1.msra.mxu1 %v2089_v16 }
 0x4c9   :  { %711 = vmatprep.subr.mxu1 %v2096_v17 }
 0x4ca   :  { %712 = vmatpush1.msra.mxu1 %v2104_v18 }
 0x4cb   :  { %713 = vmatprep.subr.mxu1 %v2110_v19 }
 0x4cc   :  { %714 = vmatpush1.msra.mxu1 %v2117_v20 }
 0x4cd   :  { %715 = vmatprep.subr.mxu1 %v2124_v21 }
 0x4ce   :  { %716 = vmatpush1.msra.mxu1 %v2131_v22 }
 0x4cf   :  { %913 = vmatprep.subr.mxu1 %v2020_v2 }
 0x57f   :  { %v545_v43 = vpop.f32.mrf.mxu1 }
 0x580   :  { %v546_v44 = vadd.f32 %v545_v43, %v472_v42 }
 0x581   :  { %v547_v46 = vpop.f32.mrf.mxu1 }
 0x582   :  { %v548_v47 = vadd.f32 %v547_v46, %v473_v45 }
 0x584   :  { %1808 = vtanh.f32 %v548_v47 }
 0x585   :  { %1810 = vtanh.f32 %v546_v44 }
 0x591   :  { %v1809_v48 = vpop.eup %1808 }
 0x592   :  { %v553_v49 = vmul.f32 %v1809_v48, %v2227_v29  ;;  %v1811_v51 = vpop.eup %1810 }
 0x593   :  { %v552_v52 = vmul.f32 %v1811_v51, %v2241_v38 }
 0x594   :  { %v555_v24 = vadd.f32 %v553_v49, %v2233_v33 }
 0x595   :  { %v554_v57 = vadd.f32 %v552_v52, %v2246_v41 }
 0x596   :  { %558 = vrot.lane.b32.xlu0 %v555_v24, %s1945_s3 }
 0x597   :  { %v556_v5 = vmul.f32 %v554_v57, %v463_v36 }
 0x608   :  { %v559_v53 = vpop.permute.xlu0 %558 }
 0x609   :  { %v561_v54 = vmul.f32 %v559_v53, %v554_v57 }
 0x60b   :  { %563 = vrot.lane.b32.xlu1 %v561_v54, %s1945_s3 }
 0x67d   :  { %v564_v59 = vpop.permute.xlu1 %563 }
 0x67e   :  { %v566_v60 = vadd.f32 %v564_v59, %v556_v5 }
 0x680   :  { %1812 = vtanh.f32 %v566_v60 }
 0x68d   :  { %v1813_v1 = vpop.eup %1812 }
 0x68e   :  { %569 = vrot.lane.b32.xlu0 %v1813_v1, %s1945_s3 }
 0x700   :  { %v570_v3 = vpop.permute.xlu0 %569 }
 0x701   :  { %v2312_v7 = vmul.f32 %v570_v3, %v555_v24 }
 0x703   :  { %1696 = vmatmul.mubr.msk.f32.vlgmr.msra.gmra.mxu0 %vm227_vm4, %v2312_v7 }
 0x704   :  { %811 = vmatpush1.msra.mxu0 %v2029_v4  ;;  %858 = vmatprep.mubr.f32.mxu0 %v1943_v0 }
 0x705   :  { %812 = vmatprep.subr.mxu0 %v2037_v6 }
 0x706   :  { %813 = vmatpush1.msra.mxu0 %v2046_v8 }
 0x707   :  { %814 = vmatprep.subr.mxu0 %v2055_v10 }
 0x708   :  { %815 = vmatpush1.msra.mxu0 %v2060_v11 }
 0x709   :  { %816 = vmatprep.subr.mxu0 %v2066_v12 }
 0x70a   :  { %817 = vmatpush1.msra.mxu0 %v2073_v13 }
 0x70b   :  { %818 = vmatprep.subr.mxu0 %v2083_v15 }
 0x70c   :  { %819 = vmatpush1.msra.mxu0 %v2089_v16 }
 0x70d   :  { %820 = vmatprep.subr.mxu0 %v2096_v17 }
 0x70e   :  { %821 = vmatpush1.msra.mxu0 %v2104_v18 }
 0x70f   :  { %822 = vmatprep.subr.mxu0 %v2110_v19 }
 0x710   :  { %823 = vmatpush1.msra.mxu0 %v2117_v20 }
 0x711   :  { %824 = vmatprep.subr.mxu0 %v2124_v21 }
 0x712   :  { %825 = vmatpush1.msra.mxu0 %v2131_v22 }
 0x713   :  { %1014 = vmatprep.subr.mxu0 %v2020_v2 }
 0x7c3   :  { %v646_v14 = vpop.f32.mrf.mxu0 }
 0x7c4   :  { %v647_v23 = vadd.f32 %v646_v14, %v573_v9 }
 0x7c5   :  { %v648_v28 = vpop.f32.mrf.mxu0 }
 0x7c6   :  { %v649_v34 = vadd.f32 %v648_v28, %v574_v26 }
 0x7c8   :  { %1814 = vtanh.f32 %v649_v34 }
 0x7c9   :  { %1816 = vtanh.f32 %v647_v23 }
 0x7d5   :  { %v1815_v35 = vpop.eup %1814 }
 0x7d6   :  { %v654_v36 = vmul.f32 %v1815_v35, %v2227_v29  ;;  %v1817_v39 = vpop.eup %1816 }
 0x7d7   :  { %v653_v2 = vmul.f32 %v1817_v39, %v2241_v38 }
 0x7d8   :  { %v656_v37 = vadd.f32 %v654_v36, %v2233_v33 }
 0x7d9   :  { %v655_v58 = vadd.f32 %v653_v2, %v2246_v41 }
 0x7da   :  { %659 = vrot.lane.b32.xlu1 %v656_v37, %s1945_s3 }
 0x7db   :  { %v657_v62 = vmul.f32 %v655_v58, %v566_v60 }
 0x84c   :  { %v660_v42 = vpop.permute.xlu1 %659 }
 0x84d   :  { %v662_v43 = vmul.f32 %v660_v42, %v655_v58 }
 0x84f   :  { %664 = vrot.lane.b32.xlu0 %v662_v43, %s1945_s3 }
 0x8c1   :  { %v665_v44 = vpop.permute.xlu0 %664 }
 0x8c2   :  { %v667_v45 = vadd.f32 %v665_v44, %v657_v62 }
 0x8c4   :  { %1818 = vtanh.f32 %v667_v45 }
 0x8d1   :  { %v1819_v46 = vpop.eup %1818 }
 0x8d2   :  { %670 = vrot.lane.b32.xlu1 %v1819_v46, %s1945_s3 }
 0x944   :  { %v671_v47 = vpop.permute.xlu1 %670 }
 0x945   :  { %v2342_v48 = vmul.f32 %v671_v47, %v656_v37 }
 0x947   :  { %1697 = vmatmul.mubr.msk.f32.vlgmr.msra.gmra.mxu1 %vm227_vm4, %v2342_v48 }
 0x948   :  { %914 = vmatpush1.msra.mxu1 %v2029_v4  ;;  %961 = vmatprep.mubr.f32.mxu1 %v1943_v0 }
 0x949   :  { %915 = vmatprep.subr.mxu1 %v2037_v6 }
 0x94a   :  { %916 = vmatpush1.msra.mxu1 %v2046_v8 }
 0x94b   :  { %917 = vmatprep.subr.mxu1 %v2055_v10 }
 0x94c   :  { %918 = vmatpush1.msra.mxu1 %v2060_v11 }
 0x94d   :  { %919 = vmatprep.subr.mxu1 %v2066_v12 }
 0x94e   :  { %920 = vmatpush1.msra.mxu1 %v2073_v13 }
 0x94f   :  { %921 = vmatprep.subr.mxu1 %v2083_v15 }
 0x950   :  { %922 = vmatpush1.msra.mxu1 %v2089_v16 }
 0x951   :  { %923 = vmatprep.subr.mxu1 %v2096_v17 }
 0x952   :  { %924 = vmatpush1.msra.mxu1 %v2104_v18 }
 0x953   :  { %925 = vmatprep.subr.mxu1 %v2110_v19 }
 0x954   :  { %926 = vmatpush1.msra.mxu1 %v2117_v20 }
 0x955   :  { %927 = vmatprep.subr.mxu1 %v2124_v21 }
 0x956   :  { %928 = vmatpush1.msra.mxu1 %v2131_v22 }
 0xa07   :  { %v751_v49 = vpop.f32.mrf.mxu1 }
 0xa08   :  { %v752_v54 = vadd.f32 %v751_v49, %v2193_v55 }
 0xa09   :  { %v753_v24 = vpop.f32.mrf.mxu1 }
 0xa0a   :  { %v754_v51 = vadd.f32 %v753_v24, %v2203_v61 }
 0xa0c   :  { %1820 = vtanh.f32 %v754_v51 }
 0xa0d   :  { %1822 = vtanh.f32 %v752_v54 }
 0xa19   :  { %v1821_v52 = vpop.eup %1820 }
 0xa1a   :  { %v759_v57 = vmul.f32 %v1821_v52, %v2227_v29  ;;  %v1823_v5 = vpop.eup %1822  ;;  %v890_v52 = vrot.slane %v2193_v55, 4 }
 0xa1b   :  { %v758_v59 = vmul.f32 %v1823_v5, %v2241_v38 }
 0xa1c   :  { %v761_v53 = vadd.f32 %v759_v57, %v2233_v33 }
 0xa1d   :  { %v760_v60 = vadd.f32 %v758_v59, %v2246_v41 }
 0xa1e   :  { %764 = vrot.lane.b32.xlu0 %v761_v53, %s1945_s3 }
 0xa1f   :  { %v762_v9 = vmul.f32 %v760_v60, %v667_v45  ;;  %v891_v45 = vrot.slane %v2203_v61, 4 }
 0xa90   :  { %v765_v1 = vpop.permute.xlu0 %764 }
 0xa91   :  { %v767_v3 = vmul.f32 %v765_v1, %v760_v60 }
 0xa93   :  { %769 = vrot.lane.b32.xlu1 %v767_v3, %s1945_s3 }
 0xb05   :  { %v770_v14 = vpop.permute.xlu1 %769 }
 0xb06   :  { %v772_v23 = vadd.f32 %v770_v14, %v762_v9 }
 0xb08   :  { %1824 = vtanh.f32 %v772_v23 }
 0xb15   :  { %v1825_v26 = vpop.eup %1824 }
 0xb16   :  { %775 = vrot.lane.b32.xlu0 %v1825_v26, %s1945_s3 }
 0xb88   :  { %v776_v28 = vpop.permute.xlu0 %775 }
 0xb89   :  { %v2371_v34 = vmul.f32 %v776_v28, %v761_v53 }
 0xb8b   :  { %1698 = vmatmul.mubr.msk.f32.vlgmr.msra.gmra.mxu0 %vm227_vm4, %v2371_v34  ;;  %v1097_v43 = vsel %vm1092_vm5, %v2371_v34, %v2342_v48 }
 0xb8c   :  { %1015 = vmatpush1.msra.mxu0 %v2029_v4  ;;  %1062 = vmatprep.mubr.f32.mxu0 %v1943_v0  ;;  %v787_v4 = vrot.slane %v2195_v56, 2 }
 0xb8d   :  { %1016 = vmatprep.subr.mxu0 %v2037_v6 }
 0xb8e   :  { %1017 = vmatpush1.msra.mxu0 %v2046_v8 }
 0xb8f   :  { %1018 = vmatprep.subr.mxu0 %v2055_v10  ;;  %v788_v10 = vrot.slane %v2211_v63, 2 }
 0xb90   :  { %1019 = vmatpush1.msra.mxu0 %v2060_v11 }
 0xb91   :  { %1020 = vmatprep.subr.mxu0 %v2066_v12 }
 0xb92   :  { %1021 = vmatpush1.msra.mxu0 %v2073_v13 }
 0xb93   :  { %1022 = vmatprep.subr.mxu0 %v2083_v15 }
 0xb94   :  { %1023 = vmatpush1.msra.mxu0 %v2089_v16 }
 0xb95   :  { %1024 = vmatprep.subr.mxu0 %v2096_v17 }
 0xb96   :  { %1025 = vmatpush1.msra.mxu0 %v2104_v18 }
 0xb97   :  { %1026 = vmatprep.subr.mxu0 %v2110_v19 }
 0xb98   :  { %1027 = vmatpush1.msra.mxu0 %v2117_v20 }
 0xb99   :  { %1028 = vmatprep.subr.mxu0 %v2124_v21 }
 0xb9a   :  { %1029 = vmatpush1.msra.mxu0 %v2131_v22 }
 0xc4b   :  { %v860_v6 = vpop.f32.mrf.mxu0 }
 0xc4c   :  { %v861_v8 = vadd.f32 %v860_v6, %v787_v4  ;;  %v991_v4 = vrot.slane %v2195_v56, 6 }
 0xc4d   :  { %v862_v11 = vpop.f32.mrf.mxu0 }
 0xc4e   :  { %v863_v12 = vadd.f32 %v862_v11, %v788_v10  ;;  %v992_v10 = vrot.slane %v2211_v63, 6  ;;  %v1144_v63 = vld [vmem:[#allocation2 + $0x78] sm:$0xff] }
 0xc4f   :  { %1186 = vmatprep.subr.mxu1 %v1144_v63 }
 0xc50   :  { %1826 = vtanh.f32 %v863_v12 }
 0xc51   :  { %1828 = vtanh.f32 %v861_v8 }
 0xc5d   :  { %v1827_v13 = vpop.eup %1826 }
 0xc5e   :  { %v868_v15 = vmul.f32 %v1827_v13, %v2227_v29  ;;  %v1829_v17 = vpop.eup %1828 }
 0xc5f   :  { %v867_v18 = vmul.f32 %v1829_v17, %v2241_v38 }
 0xc60   :  { %v870_v16 = vadd.f32 %v868_v15, %v2233_v33 }
 0xc61   :  { %v869_v19 = vadd.f32 %v867_v18, %v2246_v41 }
 0xc62   :  { %873 = vrot.lane.b32.xlu1 %v870_v16, %s1945_s3 }
 0xc63   :  { %v871_v22 = vmul.f32 %v869_v19, %v772_v23 }
 0xcd4   :  { %v874_v20 = vpop.permute.xlu1 %873 }
 0xcd5   :  { %v876_v21 = vmul.f32 %v874_v20, %v869_v19 }
 0xcd7   :  { %878 = vrot.lane.b32.xlu0 %v876_v21, %s1945_s3  ;;  %v1143_v21 = vld [vmem:[#allocation2 + $0x70] sm:$0xff] }
 0xd49   :  { %v879_v35 = vpop.permute.xlu0 %878 }
 0xd4a   :  { %v881_v36 = vadd.f32 %v879_v35, %v871_v22  ;;  %v1142_v22 = vld [vmem:[#allocation2 + $0x68] sm:$0xff]  ;;  %v1141_v35 = vld [vmem:[#allocation2 + $0x60] sm:$0xff] }
 0xd4c   :  { %1830 = vtanh.f32 %v881_v36 }
 0xd59   :  { %v1831_v37 = vpop.eup %1830 }
 0xd5a   :  { %884 = vrot.lane.b32.xlu1 %v1831_v37, %s1945_s3  ;;  %v1137_v37 = vld [vmem:[#allocation2 + $0x40] sm:$0xff] }
 0xdcc   :  { %v885_v39 = vpop.permute.xlu1 %884 }
 0xdcd   :  { %v2400_v2 = vmul.f32 %v885_v39, %v870_v16 }
 0xdcf   :  { %v1098_v58 = vsel %vm1092_vm5, %v2400_v2, %v2312_v7  ;;  %1699 = vmatmul.mubr.msk.f32.vlgmr.msra.gmra.mxu1 %vm227_vm4, %v2400_v2 }
 0xdd0   :  { %v1111_v42 = vrot.slane %v1098_v58, 6  ;;  %1234 = vmatprep.mubr.f32.mxu1 %v1943_v0  ;;  %1187 = vmatpush1.msra.mxu1 %v1143_v21 }
 0xdd1   :  { %1188 = vmatprep.subr.mxu1 %v1142_v22 }
 0xdd2   :  { %v1125_v62 = vsel %vm1119_vm6, %v1097_v43, %v1111_v42  ;;  %1189 = vmatpush1.msra.mxu1 %v1141_v35  ;;  %v1134_v43 = vld [vmem:[#allocation2 + $0x28] sm:$0xff] }
 0xe8f   :  { %v963_v44 = vpop.f32.mrf.mxu1 }
 0xe90   :  { %v964_v57 = vadd.f32 %v963_v44, %v890_v52  ;;  %v1132_v44 = vld [vmem:[#allocation2 + $0x18] sm:$0xff] }
 0xe91   :  { %v965_v46 = vpop.f32.mrf.mxu1 }
 0xe92   :  { %v966_v47 = vadd.f32 %v965_v46, %v891_v45  ;;  %v1131_v45 = vld [vmem:[#allocation2 + $0x10] sm:$0xff]  ;;  %v1130_v46 = vld [vmem:[#allocation2 + $0x8] sm:$0xff] }
 0xe94   :  { %1832 = vtanh.f32 %v966_v47  ;;  %v1129_v47 = vld [vmem:[#allocation2] sm:$0xff] }
 0xe95   :  { %1834 = vtanh.f32 %v964_v57  ;;  %v1096_v57 = vsel %vm1092_vm5, %v2342_v48, %v2371_v34  ;;  %v2460_v34 = vld [vmem:[#allocation5] sm:$0x77] }
 0xea1   :  { %v1833_v49 = vpop.eup %1832 }
 0xea2   :  { %v971_v24 = vmul.f32 %v1833_v49, %v2227_v29  ;;  %v1835_v53 = vpop.eup %1834 }
 0xea3   :  { %v970_v54 = vmul.f32 %v1835_v53, %v2241_v38 }
 0xea4   :  { %v973_v51 = vadd.f32 %v971_v24, %v2233_v33 }
 0xea5   :  { %v972_v5 = vadd.f32 %v970_v54, %v2246_v41 }
 0xea6   :  { %976 = vrot.lane.b32.xlu0 %v973_v51, %s1945_s3 }
 0xea7   :  { %v974_v60 = vmul.f32 %v972_v5, %v881_v36  ;;  %v1138_v36 = vld [vmem:[#allocation2 + $0x48] sm:$0xff] }
 0xf18   :  { %v977_v61 = vpop.permute.xlu0 %976 }
 0xf19   :  { %v979_v59 = vmul.f32 %v977_v61, %v972_v5 }
 0xf1b   :  { %981 = vrot.lane.b32.xlu1 %v979_v59, %s1945_s3 }
 0xf8d   :  { %v982_v1 = vpop.permute.xlu1 %981 }
 0xf8e   :  { %v984_v3 = vadd.f32 %v982_v1, %v974_v60 }
 0xf90   :  { %1836 = vtanh.f32 %v984_v3 }
 0xf9d   :  { %v1837_v9 = vpop.eup %1836 }
 0xf9e   :  { %987 = vrot.lane.b32.xlu0 %v1837_v9, %s1945_s3 }
0x1010   :  { %v988_v14 = vpop.permute.xlu0 %987 }
0x1011   :  { %v2421_v55 = vmul.f32 %v988_v14, %v973_v51  ;;  %v1095_v51 = vsel %vm1092_vm5, %v2312_v7, %v2400_v2 }
0x1012   :  { %v1105_v5 = vrot.slane %v1095_v51, 4 }
0x1013   :  { %v1099_v23 = vsel %vm1092_vm5, %v2421_v55, %v2282_v40  ;;  %1700 = vmatmul.mubr.msk.f32.vlgmr.msra.gmra.mxu0 %vm227_vm4, %v2421_v55  ;;  %v1094_v24 = vsel %vm1092_vm5, %v2282_v40, %v2421_v55  ;;  %v1108_v40 = vrot.slane %v1096_v57, 2  ;;  %v1507_v57 = vld [vmem:[%s2565_s8] sm:$0xff] }
0x1014   :  { %v1114_v26 = vrot.slane %v1099_v23, 4  ;;  %v1102_v54 = vrot.slane %v1094_v24, 6  ;;  %v1508_v24 = vld [vmem:[%s2565_s8 + $0x8] sm:$0xff] }
0x1016   :  { %v2429_v28 = vsel %vm1121_vm7, %v1125_v62, %v1114_v26  ;;  %v1133_v62 = vld [vmem:[#allocation2 + $0x20] sm:$0xff] }
0x10d3   :  { %v1064_v6 = vpop.f32.mrf.mxu0 }
0x10d4   :  { %v1065_v8 = vadd.f32 %v1064_v6, %v991_v4  ;;  %v1248_v6 = vld [vmem:[%s2563_s6 + $0x8] sm:$0xff] }
0x10d5   :  { %v1066_v11 = vpop.f32.mrf.mxu0 }
0x10d6   :  { %v1067_v12 = vadd.f32 %v1066_v11, %v992_v10  ;;  %v1247_v10 = vld [vmem:[%s2563_s6] sm:$0xff] }
0x10d8   :  { %1838 = vtanh.f32 %v1067_v12 }
0x10d9   :  { %1840 = vtanh.f32 %v1065_v8 }
0x10e5   :  { %v1839_v13 = vpop.eup %1838 }
0x10e6   :  { %v1072_v15 = vmul.f32 %v1839_v13, %v2227_v29  ;;  %v1841_v17 = vpop.eup %1840  ;;  %v1140_v29 = vld [vmem:[#allocation2 + $0x58] sm:$0xff] }
0x10e7   :  { %v1071_v18 = vmul.f32 %v1841_v17, %v2241_v38  ;;  %1190 = vmatprep.subr.mxu1 %v1140_v29  ;;  %v1136_v38 = vld [vmem:[#allocation2 + $0x38] sm:$0xff] }
0x10e8   :  { %v1074_v16 = vadd.f32 %v1072_v15, %v2233_v33  ;;  %v1139_v33 = vld [vmem:[#allocation2 + $0x50] sm:$0xff] }
0x10e9   :  { %v1073_v56 = vadd.f32 %v1071_v18, %v2246_v41  ;;  %1191 = vmatpush1.msra.mxu1 %v1139_v33  ;;  %v1135_v41 = vld [vmem:[#allocation2 + $0x30] sm:$0xff] }
0x10ea   :  { %1077 = vrot.lane.b32.xlu1 %v1074_v16, %s1945_s3  ;;  %1192 = vmatprep.subr.mxu1 %v1138_v36 }
0x10eb   :  { %1193 = vmatpush1.msra.mxu1 %v1137_v37  ;;  %v1075_v39 = vmul.f32 %v1073_v56, %v984_v3 }
0x10ec   :  { %1194 = vmatprep.subr.mxu1 %v1136_v38  ;;  %v1153_v38 = vrot.slane %v2460_v34, %v104_v32  ;;  %v1512_v32 = vld [vmem:[%s2565_s8 + $0x28] sm:$0xff] }
0x10ed   :  { %1195 = vmatpush1.msra.mxu1 %v1135_v41 }
0x10ee   :  { %1196 = vmatprep.subr.mxu1 %v1134_v43 }
0x10ef   :  { %1197 = vmatpush1.msra.mxu1 %v1133_v62  ;;  %v1360_v62 = vld [vmem:[#allocation7] sm:$0x3] }
0x10f0   :  { %1198 = vmatprep.subr.mxu1 %v1132_v44 }
0x10f1   :  { %1199 = vmatpush1.msra.mxu1 %v1131_v45 }
0x10f2   :  { %1200 = vmatprep.subr.mxu1 %v1130_v46  ;;  %v1511_v46 = vld [vmem:[%s2565_s8 + $0x20] sm:$0xff] }
0x10f3   :  { %1201 = vmatpush1.msra.mxu1 %v1129_v47  ;;  %v1510_v47 = vld [vmem:[%s2565_s8 + $0x18] sm:$0xff] }
0x10f4   :  { %1756 = vmatprep.subr.mxu1 %v1943_v0 }
0x115c   :  { %v1078_v19 = vpop.permute.xlu1 %1077 }
0x115d   :  { %v1080_v20 = vmul.f32 %v1078_v19, %v1073_v56 }
0x115f   :  { %1082 = vrot.lane.b32.xlu0 %v1080_v20, %s1945_s3 }
0x11d1   :  { %v1083_v58 = vpop.permute.xlu0 %1082 }
0x11d2   :  { %v1085_v42 = vadd.f32 %v1083_v58, %v1075_v39 }
0x11d4   :  { %1842 = vtanh.f32 %v1085_v42  ;;  %v1163_v42 = vrot.slane %v1153_v38, %v2178_v31 }
0x11e1   :  { %v1843_v49 = vpop.eup %1842 }
0x11e2   :  { %1088 = vrot.lane.b32.xlu1 %v1843_v49, %s1945_s3  ;;  %v1509_v49 = vld [vmem:[%s2565_s8 + $0x10] sm:$0xff] }
0x1254   :  { %v1089_v52 = vpop.permute.xlu1 %1088 }
0x1255   :  { %v1091_v53 = vmul.f32 %v1089_v52, %v1074_v16 }
0x1257   :  { %v1093_v61 = vsel %vm1092_vm5, %v2252_v50, %v1091_v53  ;;  %v1100_v59 = vsel %vm1092_vm5, %v1091_v53, %v2252_v50  ;;  %v1149_v50 = vrot.slane %v2460_v34, %v2178_v31  ;;  %v1596_v53 = vld [vmem:[%s2566_s9 + $0x18] sm:$0xff] }
0x1258   :  { %v1120_v60 = vsel %vm1119_vm6, %v1093_v61, %v1102_v54  ;;  %v1117_v2 = vrot.slane %v1100_v59, 2  ;;  %v1595_v61 = vld [vmem:[%s2566_s9 + $0x10] sm:$0xff]  ;;  %v1594_v59 = vld [vmem:[%s2566_s9 + $0x8] sm:$0xff] }
0x1259   :  { %v1122_v7 = vsel %vm1121_vm7, %v1120_v60, %v1105_v5  ;;  %v1159_v3 = vrot.slane %v1149_v50, %v2178_v31  ;;  %v1513_v31 = vld [vmem:[%s2565_s8 + $0x30] sm:$0xff]  ;;  %v1518_v60 = vrot.slane %v2460_v34, %v2223_v27  ;;  %v1600_v50 = vrot.slane %v2460_v34, %v2230_v30 }
0x125a   :  { %v1124_v1 = vsel %vm1123_vm8, %v1122_v7, %v1108_v40  ;;  %v1127_v48 = vsel %vm1123_vm8, %v2429_v28, %v1117_v2  ;;  %v1593_v40 = vld [vmem:[%s2566_s9] sm:$0xff] }
0x125b   :  { %1701 = vmatmul.mubr.msk.f32.vlgmr.msra.gmra.mxu1 %vm227_vm4, %v1124_v1 }
0x125c   :  { %1240 = vmatprep.mubr.f32.mxu1 %v1943_v0  ;;  %1757 = vmatpush3.msra.mxu1 %v1514_v25 }
0x125d   :  { %1758 = vmatprep.subr.mxu1 %v1943_v0 }
0x125e   :  { %1759 = vmatpush3.msra.mxu1 %v1513_v31 }
0x125f   :  { %1702 = vmatmul.mubr.msk.f32.gmra.mxu1 %vm227_vm4, %v1127_v48  ;;  %1760 = vmatprep.subr.mxu1 %v1943_v0 }
0x1260   :  { %1772 = vmatprep.mubr.msk.f32.mxu1 %vm1946_vm9, %v1943_v0  ;;  %1761 = vmatpush3.msra.mxu1 %v1512_v32 }
0x1261   :  { %1762 = vmatprep.subr.mxu1 %v1943_v0 }
0x1262   :  { %1763 = vmatpush3.msra.mxu1 %v1511_v46 }
0x1263   :  { %1764 = vmatprep.subr.mxu1 %v1943_v0 }
0x1264   :  { %1765 = vmatpush3.msra.mxu1 %v1510_v47 }
0x1265   :  { %1766 = vmatprep.subr.mxu1 %v1943_v0 }
0x1266   :  { %1767 = vmatpush3.msra.mxu1 %v1509_v49 }
0x1267   :  { %1768 = vmatprep.subr.mxu1 %v1943_v0 }
0x1268   :  { %1769 = vmatpush3.msra.mxu1 %v1508_v24 }
0x1269   :  { %1770 = vmatprep.subr.mxu1 %v1943_v0 }
0x126a   :  { %1771 = vmatpush3.msra.mxu1 %v1507_v57 }
0x131b   :  { %v1236_v9 = vpop.f32.mrf.mxu1 }
0x131c   :  { %v1237_v14 = vadd.f32 %v1236_v9, %v1159_v3 }
0x131d   :  { %v1238_v55 = vpop.f32.mrf.mxu1 }
0x131e   :  { %1251 = vrot.lane.b32.xlu1 %v1237_v14, %s1945_s3  ;;  %1739 = vmatprep.mubr.msk.f32.mxu0 %vm227_vm4, %v1237_v14  ;;  %v1239_v45 = vadd.f32 %v1238_v55, %v1163_v42 }
0x131f   :  { %v1242_v23 = vpop.f32.mrf.mxu1 }
0x1320   :  { %v1243_v26 = vadd.f32 %v1242_v23, %v1159_v3 }
0x1321   :  { %v1244_v58 = vpop.f32.mrf.mxu1 }
0x1322   :  { %1253 = vrot.lane.b32.xlu0 %v1243_v26, %s1945_s3  ;;  %v1245_v44 = vadd.f32 %v1244_v58, %v1163_v42  ;;  %s1947_s3 = smov [#allocation8]  }
0x1323   :  { %s1682_s27 = sshll.u32 %s1947_s3, 4  ;;  %s1683_s27 = int_to_ptr.vmem [resolvable:$true] %s1682_s27 }
0x1324   :  { %s1912_s9 = scalar_lea.vmem %s1683_s27, 32  ;;  %p1917_p2 = scmp.lt.s32.totalorder %s1683_s27, %s1683_s27 }
0x1325   :  { %p1913_p1 = scmp.ne.s32.totalorder %s1683_s27, %s1912_s9  ;;  %p1918_p3 = scmp.lt.s32.totalorder %s1912_s9, %s1912_s9 }
0x1327   :  { %p1919_p4 = por %p1918_p3, %p1917_p2 }
0x1329   :  { %p1920_p5 = pnand %p1919_p4, %p1913_p1 }
0x1390   :  { %v1252_v4 = vpop.permute.xlu1 %1251 }
0x1394   :  { %v1254_v28 = vpop.permute.xlu0 %1253 }
0x1395   :  { %1735 = vmatprep.subr.msk.mxu0 %vm227_vm4, %v1254_v28 }
0x1396   :  { %1736 = vmatpush3.xpose.msk.msra.mxu0 %vm227_vm4, %v1254_v28 }
0x1397   :  { %1737 = vmatprep.subr.msk.mxu0 %vm227_vm4, %v1252_v4 }
0x139a   :  { %1738 = vmatpush3.xpose.msk.msra.mxu0 %vm227_vm4, %v1252_v4 }
0x139b   :  { %1742 = vmatprep.subr.mxu0 %v1943_v0 }
0x139d   :  { %1740 = vmatmul.mubr.msk.f32.vlgmr.msra.gmra.mxu0 %vm227_vm4, %v1243_v26 }
0x139e   :  { %1746 = vmatprep.mubr.msk.f32.mxu0 %vm1946_vm9, %v1943_v0 }
0x145d   :  { %v1741_v8 = vpop.f32.mrf.mxu0 }
0x145e   :  { %v1335_v11 = vadd.f32 %v1741_v8, %v1248_v6 }
0x145f   :  { %v1329_v12 = vpop.f32.mrf.mxu0 }
0x1460   :  { %v1330_v13 = vadd.f32 %v1329_v12, %v1247_v10  ;;  %v1341_v15 = vsel %vm116_vm0, %v1335_v11, -inf }
0x1461   :  { %1342 = vmax.xlane.f32.xlu0 %v1341_v15 }
0x1462   :  { %v1338_v16 = vsel %vm116_vm0, %v1330_v13, -inf }
0x1463   :  { %1339 = vmax.xlane.f32.xlu1 %v1338_v16 }
0x14ea   :  { %v1343_v17 = vpop.xlane.xlu0 %1342 }
0x14eb   :  { %v1345_v18 = vsub.f32 %v1335_v11, %v1343_v17 }
0x14ec   :  { %v1340_v56 = vpop.xlane.xlu1 %1339 }
0x14ed   :  { %v1348_v19 = vmul.f32 1.442695, %v1345_v18  ;;  %v1344_v20 = vsub.f32 %v1330_v13, %v1340_v56 }
0x14ef   :  { %1844 = vpow2.f32 %v1348_v19  ;;  %v1346_v63 = vmul.f32 1.442695, %v1344_v20 }
0x14f1   :  { %1846 = vpow2.f32 %v1346_v63 }
0x14fc   :  { %v1845_v21 = vpop.eup %1844 }
0x14fd   :  { %v1353_v22 = vsel %vm116_vm0, %v1845_v21, 0.0 }
0x14fe   :  { %v1847_v35 = vpop.eup %1846  ;;  %1354 = vadd.xlane.f32.xlu0 %v1353_v22 }
0x14ff   :  { %v1350_v29 = vsel %vm116_vm0, %v1847_v35, 0.0 }
0x1502   :  { %1351 = vadd.xlane.f32.xlu0 %v1350_v29 }
0x1587   :  { %v1355_v33 = vpop.xlane.xlu0 %1354 }
0x1588   :  { %1848 = vrcp.f32 %v1355_v33 }
0x158b   :  { %v1352_v36 = vpop.xlane.xlu0 %1351 }
0x158c   :  { %1850 = vrcp.f32 %v1352_v36 }
0x1595   :  { %v1849_v37 = vpop.eup %1848 }
0x1596   :  { %v1359_v41 = vmul.f32 %v1849_v37, %v1845_v21 }
0x1598   :  { %1743 = vmatpush3.msra.mxu0 %v1359_v41 }
0x1599   :  { %v1851_v39 = vpop.eup %1850  ;;  %1744 = vmatprep.subr.mxu0 %v1943_v0 }
0x159a   :  { %v1357_v43 = vmul.f32 %v1851_v39, %v1847_v35 }
0x159c   :  { %1745 = vmatpush3.msra.mxu0 %v1357_v43 }
0x159d   :  { %1747 = vmatmul.mubr.msk.f32.vlgmr.msra.gmra.mxu0 %vm116_vm0, %v1360_v62  ;;  %1749 = vmatprep.subr.mxu0 %v1943_v0 }
0x159e   :  { %1750 = vmatpush3.msra.mxu0 %v1245_v44  ;;  %1753 = vmatprep.mubr.msk.f32.mxu0 %vm1946_vm9, %v1943_v0 }
0x159f   :  { %1751 = vmatprep.subr.mxu0 %v1943_v0 }
0x15a0   :  { %1752 = vmatpush3.msra.mxu0 %v1239_v45 }
0x15a1   :  { %1775 = vmatprep.subr.mxu0 %v1943_v0 }
0x165d   :  { %v1430_v51 = vpop.f32.mrf.mxu0 }
0x165e   :  { %1754 = vmatmul.mubr.msk.f32.vlgmr.msra.gmra.mxu0 %vm116_vm0, %v1430_v51 }
0x165f   :  { %v1748_v52 = vpop.f32.mrf.mxu0  ;;  %1783 = vmatprep.mubr.msk.f32.mxu0 %vm1946_vm9, %v1943_v0  ;;  %1776 = vmatpush3.msra.mxu0 %v1596_v53 }
0x1660   :  { %1777 = vmatprep.subr.mxu0 %v1943_v0 }
0x1661   :  { %1778 = vmatpush3.msra.mxu0 %v1595_v61 }
0x1662   :  { %1779 = vmatprep.subr.mxu0 %v1943_v0 }
0x1663   :  { %1780 = vmatpush3.msra.mxu0 %v1594_v59 }
0x1664   :  { %1781 = vmatprep.subr.mxu0 %v1943_v0 }
0x1665   :  { %1782 = vmatpush3.msra.mxu0 %v1593_v40 }
0x171e   :  { %v1503_v54 = vpop.f32.mrf.mxu0 }
0x171f   :  { %1773 = vmatmul.mubr.msk.f32.vlgmr.msra.gmra.mxu1 %vm227_vm4, %v1503_v54 }
0x1720   :  { %v1755_v5 = vpop.f32.mrf.mxu0 }
0x17df   :  { %v1588_v7 = vpop.f32.mrf.mxu1 }
0x17e0   :  { %v1589_v2 = vadd.f32 %v1588_v7, %v1518_v60 }
0x17e1   :  { %v1774_v1 = vpop.f32.mrf.mxu1 }
0x17e2   :  { %v1592_v48 = vmax.f32 %v1589_v2, 0.0 }
0x17e4   :  { %1784 = vmatmul.mubr.msk.f32.vlgmr.msra.gmra.mxu0 %vm1092_vm5, %v1592_v48 }
0x18a4   :  { %v1670_v3 = vpop.f32.mrf.mxu0 }
0x18a5   :  { %v1671_v9 = vadd.f32 %v1670_v3, %v1600_v50 }
0x18a6   :  { %v1785_v0 = vpop.f32.mrf.mxu0 }
0x18a7   :  { %1675 = vst.msk [vmem:[#allocation8] sm:$0x3] %vm1674_vm10, %v1671_v9 }
0x18a8   :  { %1923 = shalt.err (!%p1920_p5)
}
0x18a9   :  { %1685 = dma.vmem_to_hbm [thread:$0]  %s1683_s27, 32, %s2567_s10, [#allocation4]  }
0x18aa   :  { %1936 = dma.done.wait [#allocation4], 32  }
0x18ab   :  { %1937 = vsyncadd [#allocation4], 4294967264 }
0x18ac   :  { %1689 = vsyncpa [#allocation3], 1 }
0x18ad   :  { %1690 = vsyncpa [#allocation6], 1 }
0x18ae   :  { %1691 = vsyncpa [#allocation4], 1 }

</bundles_post_ra>
